<compile_context>
chip_gen: v5e
topology: v5e:2x2
jax: 0.10.0
libtpu: 0.0.40
codegen_flags: <defaults>
</compile_context>

<pallas_src>
import functools

import jax
import jax.numpy as jnp
from jax.experimental import pallas as pl
from jax.experimental.pallas import tpu as pltpu

EPS = 1e-5
SLOPE = 0.2        # LeakyReLU negative slope
LANE = 128         # output-channel (lane) padding
KALIGN = 16        # contraction-dim padding (bf16 sublane tile), NOT 128


def _round_up(x, m):
    return ((x + m - 1) // m) * m


def _leaky(x):
    # slope < 1  =>  max(x, slope*x) == LeakyReLU(x)
    return jnp.maximum(x, SLOPE * x)


# ----------------------------- tiling / budget ------------------------------

@functools.lru_cache(maxsize=None)
def _vmem_limit_bytes():
    cap = 64 * 1024 * 1024                      # v7x-safe fallback
    try:
        cap = int(pltpu.get_tpu_info().vmem_capacity_bytes)
    except Exception:
        pass
    # v5e/v6e (128 MiB physical) -> 96 MiB scoped; v7x (64 MiB) -> 48 MiB.
    return min(cap * 3 // 4, 112 * 1024 * 1024)


def _compiler_params():
    # Row-tile axis carries no cross-tile state (stats are per-tile outputs), so it is
    # megacore-parallel (up to 2x on v7x; no effect on v5e/v6e).
    return pltpu.CompilerParams(
        dimension_semantics=("parallel",),
        vmem_limit_bytes=_vmem_limit_bytes())


def _auto_block_rows(kp, ocp, ksp=0):
    # Per-output-row VMEM: double-buffered bf16 patch (and skip-patch) tiles plus
    # double-buffered f32 z / output tiles across both kernels.
    per_row = 4 * kp + 4 * ksp + 16 * ocp
    budget = _vmem_limit_bytes() // 2           # headroom for weights, params, internal
    tm = budget // max(per_row, 1)
    return max(8, min(2048, (tm // 8) * 8))


def _row_tiling(m, block_rows):
    tm = max(8, (int(block_rows) // 8) * 8)
    tm = min(tm, _round_up(m, 8))
    mp = _round_up(m, tm)
    return tm, mp, mp // tm


# ----------------------------- Pallas kernels ------------------------------
# Kernel A (one per conv that is batch-normed): single MXU pass per row tile.
#   z = patches @ W        -> written to HBM (consumed by kernel B)
#   per-tile sum / sumsq   -> written as an (8, ocp) stats block per tile
# Conv bias is omitted on purpose: a per-channel constant is exactly cancelled by the
# BatchNorm mean subtraction (training-mode batch stats).

def _mm_stats_kernel(p_ref, w_ref, z_ref, st_ref):
    z = jnp.dot(p_ref[...], w_ref[...], preferred_element_type=jnp.float32)
    z_ref[...] = z
    st_ref[...] = jnp.zeros_like(st_ref)
    st_ref[0:1, :] = jnp.sum(z, axis=0, keepdims=True)
    st_ref[1:2, :] = jnp.sum(z * z, axis=0, keepdims=True)


# Kernel B: cheap apply step. sb_ref rows: 0 = scale, 1 = bias (folded BN), 2 = skip bias.

def _bn_act_kernel(z_ref, sb_ref, o_ref):
    zn = z_ref[...] * sb_ref[0:1, :] + sb_ref[1:2, :]      # folded BN (one FMA)
    o_ref[...] = _leaky(zn).astype(o_ref.dtype)


def _bn_skip_act_kernel(z_ref, ps_ref, ws_ref, sb_ref, o_ref):
    skip = jnp.dot(ps_ref[...], ws_ref[...],
                   preferred_element_type=jnp.float32) + sb_ref[2:3, :]
    zn = z_ref[...] * sb_ref[0:1, :] + sb_ref[1:2, :] + skip
    o_ref[...] = _leaky(zn).astype(o_ref.dtype)


# ------------------------------- JAX glue ----------------------------------

def im2col_nhwc(x, kh, kw, stride, pad):
    """x: [N, H, W, C] -> patches [N*OH*OW, KH*KW*C] (kh, kw outer / C inner)."""
    n, h, w, c = x.shape
    xp = jnp.pad(x, ((0, 0), (pad, pad), (pad, pad), (0, 0)))
    oh = (h + 2 * pad - kh) // stride + 1
    ow = (w + 2 * pad - kw) // stride + 1
    cols = []
    for i in range(kh):
        for j in range(kw):
            cols.append(xp[:, i:i + stride * (oh - 1) + 1:stride,
                           j:j + stride * (ow - 1) + 1:stride, :])
    patches = jnp.concatenate(cols, axis=-1)
    return patches.reshape(n * oh * ow, kh * kw * c), oh, ow


def reorder_weight(w_oihw):
    """[OC, IC, KH, KW] -> [KH*KW*IC, OC] matching im2col ordering."""
    oc, ic, kh, kw = w_oihw.shape
    return jnp.transpose(w_oihw, (2, 3, 1, 0)).reshape(kh * kw * ic, oc)


def _pad2d(x, rows, cols, dtype):
    out = jnp.zeros((rows, cols), dtype)
    return out.at[:x.shape[0], :x.shape[1]].set(x.astype(dtype))


def _conv_matmul_stats(p_pad, w_pad, tm, mp, n_rt, kp, ocp):
    """Kernel A launcher: z = p_pad @ w_pad plus per-row-tile BN partial stats."""
    cost = pl.CostEstimate(
        flops=2 * mp * kp * ocp, transcendentals=0,
        bytes_accessed=mp * kp * 2 + kp * ocp * 2 + mp * ocp * 4 + n_rt * 8 * ocp * 4)
    z, stats = pl.pallas_call(
        _mm_stats_kernel,
        out_shape=(jax.ShapeDtypeStruct((mp, ocp), jnp.float32),
                   jax.ShapeDtypeStruct((n_rt * 8, ocp), jnp.float32)),
        grid_spec=pltpu.PrefetchScalarGridSpec(
            num_scalar_prefetch=0, grid=(n_rt,),
            in_specs=[pl.BlockSpec((tm, kp), lambda r: (r, 0)),
                      pl.BlockSpec((kp, ocp), lambda r: (0, 0))],
            out_specs=[pl.BlockSpec((tm, ocp), lambda r: (r, 0)),
                       pl.BlockSpec((8, ocp), lambda r: (r, 0))]),
        compiler_params=_compiler_params(),
        cost_estimate=cost,
    )(p_pad, w_pad)
    return z, stats


def _fold_bn(stats, m, tm, n_rt, gamma, beta, oc, ocp):
    """Chan-style merge of per-tile (count, mean, M2) -> per-channel (scale, bias)."""
    st = stats.reshape(n_rt, 8, ocp)
    sums, sumsqs = st[:, 0, :], st[:, 1, :]                       # (n_rt, ocp)
    counts = jnp.minimum(tm, m - tm * jnp.arange(n_rt))
    counts = jnp.maximum(counts, 1).astype(jnp.float32)[:, None]  # (n_rt, 1)
    mean_j = sums / counts
    m2_j = sumsqs - counts * mean_j * mean_j                      # per-tile centered SS
    mean = jnp.sum(sums, axis=0) / float(m)
    m2 = jnp.sum(m2_j, axis=0) + jnp.sum(counts * jnp.square(mean_j - mean[None, :]), axis=0)
    var = jnp.maximum(m2 / float(m), 0.0)
    gpad = jnp.zeros((ocp,), jnp.float32).at[:oc].set(gamma)
    bpad = jnp.zeros((ocp,), jnp.float32).at[:oc].set(beta)
    scale = gpad * jax.lax.rsqrt(var + EPS)
    bias = bpad - mean * scale
    return scale, bias


def conv_bn_act(patches, w_oihw, gamma, beta, *, block_rows=None):
    """LeakyReLU(BatchNorm(conv)) on im2col patches. Returns [M, OC] bfloat16."""
    m, k = patches.shape
    oc = w_oihw.shape[0]
    kp, ocp = _round_up(k, KALIGN), _round_up(oc, LANE)
    if block_rows is None:
        block_rows = _auto_block_rows(kp, ocp)
    tm, mp, n_rt = _row_tiling(m, block_rows)

    p_pad = _pad2d(patches, mp, kp, jnp.bfloat16)
    w_pad = _pad2d(reorder_weight(w_oihw), kp, ocp, jnp.bfloat16)

    z, stats = _conv_matmul_stats(p_pad, w_pad, tm, mp, n_rt, kp, ocp)
    scale, bias = _fold_bn(stats, m, tm, n_rt, gamma, beta, oc, ocp)
    sb = jnp.zeros((8, ocp), jnp.float32).at[0].set(scale).at[1].set(bias)

    cost = pl.CostEstimate(
        flops=4 * mp * ocp, transcendentals=0,
        bytes_accessed=mp * ocp * 4 + 8 * ocp * 4 + mp * ocp * 2)
    a = pl.pallas_call(
        _bn_act_kernel,
        out_shape=jax.ShapeDtypeStruct((mp, ocp), jnp.bfloat16),   # bf16 intermediate
        grid_spec=pltpu.PrefetchScalarGridSpec(
            num_scalar_prefetch=0, grid=(n_rt,),
            in_specs=[pl.BlockSpec((tm, ocp), lambda r: (r, 0)),
                      pl.BlockSpec((8, ocp), lambda r: (0, 0))],
            out_specs=pl.BlockSpec((tm, ocp), lambda r: (r, 0))),
        compiler_params=_compiler_params(),
        cost_estimate=cost,
    )(z, sb)
    return a[:m, :oc]


def conv_bn_skip_act(patches, w_oihw, gamma, beta,
                     skip_patches, ws_oihw, skip_bias, *, block_rows=None):
    """LeakyReLU(BatchNorm(conv) + skip_conv). Returns [M, OC] float32."""
    m, k = patches.shape
    ks = skip_patches.shape[1]
    oc = w_oihw.shape[0]
    kp, ksp, ocp = _round_up(k, KALIGN), _round_up(ks, KALIGN), _round_up(oc, LANE)
    if block_rows is None:
        block_rows = _auto_block_rows(kp, ocp, ksp)
    tm, mp, n_rt = _row_tiling(m, block_rows)

    p_pad = _pad2d(patches, mp, kp, jnp.bfloat16)
    w_pad = _pad2d(reorder_weight(w_oihw), kp, ocp, jnp.bfloat16)
    ps_pad = _pad2d(skip_patches, mp, ksp, jnp.bfloat16)
    ws_pad = _pad2d(reorder_weight(ws_oihw), ksp, ocp, jnp.bfloat16)

    z, stats = _conv_matmul_stats(p_pad, w_pad, tm, mp, n_rt, kp, ocp)
    scale, bias = _fold_bn(stats, m, tm, n_rt, gamma, beta, oc, ocp)
    sb = (jnp.zeros((8, ocp), jnp.float32)
          .at[0].set(scale).at[1].set(bias).at[2, :oc].set(skip_bias))

    cost = pl.CostEstimate(
        flops=2 * mp * ksp * ocp + 6 * mp * ocp, transcendentals=0,
        bytes_accessed=(mp * ocp * 4 + mp * ksp * 2 + ksp * ocp * 2
                        + 8 * ocp * 4 + mp * ocp * 4))
    out = pl.pallas_call(
        _bn_skip_act_kernel,
        out_shape=jax.ShapeDtypeStruct((mp, ocp), jnp.float32),
        grid_spec=pltpu.PrefetchScalarGridSpec(
            num_scalar_prefetch=0, grid=(n_rt,),
            in_specs=[pl.BlockSpec((tm, ocp), lambda r: (r, 0)),    # z (aliased to out)
                      pl.BlockSpec((tm, ksp), lambda r: (r, 0)),    # skip patches
                      pl.BlockSpec((ksp, ocp), lambda r: (0, 0)),   # skip weight
                      pl.BlockSpec((8, ocp), lambda r: (0, 0))],    # scale/bias/skip-bias
            out_specs=pl.BlockSpec((tm, ocp), lambda r: (r, 0))),
        input_output_aliases={0: 0},                                # rewrite z in place
        compiler_params=_compiler_params(),
        cost_estimate=cost,
    )(z, ps_pad, ws_pad, sb)
    return out[:m, :oc]


class ResDownBlockPallas:
    """Deterministically-initialized parameters + Pallas forward (NCHW in / NCHW out)."""

    def __init__(self, in_channels, out_channels, kernel_size, stride, padding, key):
        self.k, self.s, self.p = kernel_size, stride, padding
        self.oc = out_channels
        ks = jax.random.split(key, 10)

        def wconv(kk, oc, ic, kh, kw):
            bound = 1.0 / jnp.sqrt(ic * kh * kw)
            return jax.random.uniform(kk, (oc, ic, kh, kw), jnp.float32, -bound, bound)

        def bconv(kk, oc, fan_in):
            bound = 1.0 / jnp.sqrt(fan_in)
            return jax.random.uniform(kk, (oc,), jnp.float32, -bound, bound)

        self.w1 = wconv(ks[0], out_channels, in_channels, 3, 3)
        self.b1 = bconv(ks[1], out_channels, in_channels * 9)
        self.w2 = wconv(ks[2], out_channels, out_channels, kernel_size, kernel_size)
        self.b2 = bconv(ks[3], out_channels, out_channels * kernel_size * kernel_size)
        self.ws = wconv(ks[4], out_channels, in_channels, kernel_size, kernel_size)
        self.bs = bconv(ks[5], out_channels, in_channels * kernel_size * kernel_size)
        # BatchNorm affine params (PyTorch init is ones/zeros; perturb for a stronger test)
        self.g1 = 1.0 + 0.1 * jax.random.normal(ks[6], (out_channels,), jnp.float32)
        self.be1 = 0.1 * jax.random.normal(ks[7], (out_channels,), jnp.float32)
        self.g2 = 1.0 + 0.1 * jax.random.normal(ks[8], (out_channels,), jnp.float32)
        self.be2 = 0.1 * jax.random.normal(ks[9], (out_channels,), jnp.float32)

    def __call__(self, x_nchw, block_rows=None):
        n, c, h, w = x_nchw.shape
        oc = self.oc
        x_nhwc = jnp.transpose(x_nchw, (0, 2, 3, 1)).astype(jnp.float32)

        # ---- stage 1: conv1 (3x3/s1/p1) -> bn1 -> LeakyReLU (matmul+stats, then apply)
        p1, oh1, ow1 = im2col_nhwc(x_nhwc, 3, 3, 1, 1)
        a1 = conv_bn_act(p1, self.w1, self.g1, self.be1,
                         block_rows=block_rows).reshape(n, oh1, ow1, oc)   # bf16

        # ---- stage 2: conv2 -> bn2 (+ skip_conv(x)) -> LeakyReLU
        p2, oh2, ow2 = im2col_nhwc(a1, self.k, self.k, self.s, self.p)     # bf16 patches
        ps, ohs, ows = im2col_nhwc(x_nhwc, self.k, self.k, self.s, self.p)
        assert (oh2, ow2) == (ohs, ows)
        out = conv_bn_skip_act(p2, self.w2, self.g2, self.be2,
                               ps, self.ws, self.bs,
                               block_rows=block_rows).reshape(n, oh2, ow2, oc)
        return jnp.transpose(out, (0, 3, 1, 2))  # back to NCHW


# ------------------------- pure-JAX reference (sanity) ----------------------
# Mirrors the kernel's MXU precision (bf16 conv operands, f32 accumulation);
# BN / activation / bias math in f32.  Conv biases included (exactly cancelled by the
# BN mean subtraction, which the kernel exploits).

def _conv_ref(x, w, b, stride, pad):
    y = jax.lax.conv_general_dilated(
        x.astype(jnp.bfloat16), w.astype(jnp.bfloat16), (stride, stride),
        [(pad, pad), (pad, pad)], dimension_numbers=("NCHW", "OIHW", "NCHW"),
        preferred_element_type=jnp.float32)
    return y + b[None, :, None, None]


def _bn_ref(z, gamma, beta):
    mean = jnp.mean(z, axis=(0, 2, 3), keepdims=True)
    var = jnp.mean((z - mean) ** 2, axis=(0, 2, 3), keepdims=True)
    return (z - mean) * jax.lax.rsqrt(var + EPS) * gamma[None, :, None, None] \
        + beta[None, :, None, None]


def _ref_forward(mod, x):
    skip = _conv_ref(x, mod.ws, mod.bs, mod.s, mod.p)
    z = _conv_ref(x, mod.w1, mod.b1, 1, 1)
    z = _leaky(_bn_ref(z, mod.g1, mod.be1))
    z = _conv_ref(z, mod.w2, mod.b2, mod.s, mod.p)
    z = _bn_ref(z, mod.g2, mod.be2) + skip
    return _leaky(z)


# ----------------------------------- main -----------------------------------

if __name__ == "__main__":
    key = jax.random.PRNGKey(0)
    k_param, k_x = jax.random.split(key)

    # ResDownBlock(in_channels=4, out_channels=8, kernel_size=4, stride=2, padding=1)
    block = ResDownBlockPallas(in_channels=4, out_channels=8,
                               kernel_size=4, stride=2, padding=1, key=k_param)

    x = jax.random.normal(k_x, (2, 4, 16, 16), jnp.float32)  # NCHW, like PyTorch

    ref = jax.block_until_ready(_ref_forward(block, x))

    fwd_auto = jax.jit(lambda v: block(v))                    # auto (single-tile) path
    fwd_tiled = jax.jit(lambda v: block(v, block_rows=64))    # force multi-row-tile path
    out_auto = jax.block_until_ready(fwd_auto(x))
    out_tiled = jax.block_until_ready(fwd_tiled(x))

    assert out_auto.shape == (2, 8, 8, 8), out_auto.shape
    assert out_tiled.shape == (2, 8, 8, 8), out_tiled.shape

    # 1e-2 tolerance: both paths use bf16 MXU inputs and the intermediate activation is
    # quantized to bf16 independently in each path (single-ulp flips possible).
    for name, out in (("auto", out_auto), ("tiled", out_tiled)):
        err = float(jnp.max(jnp.abs(out - ref)))
        if err > 1e-2:
            raise AssertionError(f"Pallas ({name}) mismatch vs JAX reference, max abs err = {err}")

    print("KERNEL_OK")
</pallas_src>

<mosaic_0001>
module attributes {stable_mosaic.version = 11 : i64} {
  func.func @_mm_stats_kernel(%arg0: i32, %arg1: memref<512x48xbf16, #tpu.memory_space<vmem>>, %arg2: memref<48x128xbf16, #tpu.memory_space<vmem>>, %arg3: memref<512x128xf32, #tpu.memory_space<vmem>>, %arg4: memref<8x128xf32, #tpu.memory_space<vmem>>) attributes {dimension_semantics = [#tpu.dimension_semantics<parallel>], iteration_bounds = array<i64: 1>, scalar_prefetch = 0 : i64, scratch_operands = 0 : i64, tpu.core_type = #tpu.core_type<tc>, window_params = [{transform_indices = @transform_0, window_bounds = array<i64: 512, 48>}, {pipeline_mode = #tpu.pipeline_mode<synchronous>, transform_indices = @transform_1, window_bounds = array<i64: 48, 128>}, {transform_indices = @transform_2, window_bounds = array<i64: 512, 128>}, {transform_indices = @transform_3, window_bounds = array<i64: 8, 128>}]} {
    %c0 = arith.constant 0 : index
    %c0_0 = arith.constant 0 : index
    %0 = vector.load %arg1[%c0, %c0_0] : memref<512x48xbf16, #tpu.memory_space<vmem>>, vector<512x48xbf16>
    %c0_1 = arith.constant 0 : index
    %c0_2 = arith.constant 0 : index
    %1 = vector.load %arg2[%c0_1, %c0_2] : memref<48x128xbf16, #tpu.memory_space<vmem>>, vector<48x128xbf16>
    %cst = arith.constant dense<0.000000e+00> : vector<512x128xf32>
    %2 = tpu.matmul %0, %1, %cst {dimension_numbers = #tpu.dot_dimension_numbers<[1], [0], [0], [1], [0, 0, 1, 1], [], []>} : vector<512x48xbf16>, vector<48x128xbf16>, vector<512x128xf32> -> vector<512x128xf32>
    %c0_3 = arith.constant 0 : index
    %c0_4 = arith.constant 0 : index
    %3 = vector.load %arg3[%c0_3, %c0_4] : memref<512x128xf32, #tpu.memory_space<vmem>>, vector<512x128xf32>
    tpu.vector_store %arg3[%c0_3, %c0_4], %2 {strides = array<i32>} : memref<512x128xf32, #tpu.memory_space<vmem>>, vector<512x128xf32>,
    %cst_5 = arith.constant 0.000000e+00 : f32
    %4 = vector.broadcast %cst_5 : f32 to vector<8x128xf32>
    %c0_6 = arith.constant 0 : index
    %c0_7 = arith.constant 0 : index
    %5 = vector.load %arg4[%c0_6, %c0_7] : memref<8x128xf32, #tpu.memory_space<vmem>>, vector<8x128xf32>
    tpu.vector_store %arg4[%c0_6, %c0_7], %4 {strides = array<i32>} : memref<8x128xf32, #tpu.memory_space<vmem>>, vector<8x128xf32>,
    %cst_8 = arith.constant dense<0.000000e+00> : vector<128xf32>
    %6 = vector.multi_reduction <add>, %2, %cst_8 [0] : vector<512x128xf32> to vector<128xf32>
    %7 = vector.shape_cast %6 : vector<128xf32> to vector<1x128xf32>
    %c0_9 = arith.constant 0 : index
    %c0_10 = arith.constant 0 : index
    %8 = vector.load %arg4[%c0_9, %c0_10] : memref<8x128xf32, #tpu.memory_space<vmem>>, vector<1x128xf32>
    tpu.vector_store %arg4[%c0_9, %c0_10], %7 {strides = array<i32>} : memref<8x128xf32, #tpu.memory_space<vmem>>, vector<1x128xf32>,
    %9 = arith.mulf %2, %2 : vector<512x128xf32>
    %cst_11 = arith.constant dense<0.000000e+00> : vector<128xf32>
    %10 = vector.multi_reduction <add>, %9, %cst_11 [0] : vector<512x128xf32> to vector<128xf32>
    %11 = vector.shape_cast %10 : vector<128xf32> to vector<1x128xf32>
    %c1 = arith.constant 1 : index
    %c0_12 = arith.constant 0 : index
    %12 = vector.load %arg4[%c1, %c0_12] : memref<8x128xf32, #tpu.memory_space<vmem>>, vector<1x128xf32>
    tpu.vector_store %arg4[%c1, %c0_12], %11 {strides = array<i32>} : memref<8x128xf32, #tpu.memory_space<vmem>>, vector<1x128xf32>,
    return
  }
  func.func @transform_0(%arg0: i32) -> (i32, i32) {
    %c0_i32 = arith.constant 0 : i32
    %c0_i32_0 = arith.constant 0 : i32
    return %arg0, %c0_i32 : i32, i32
  }
  func.func @transform_1(%arg0: i32) -> (i32, i32) {
    %c0_i32 = arith.constant 0 : i32
    %c0_i32_0 = arith.constant 0 : i32
    %c0_i32_1 = arith.constant 0 : i32
    return %c0_i32, %c0_i32_0 : i32, i32
  }
  func.func @transform_2(%arg0: i32) -> (i32, i32) {
    %c0_i32 = arith.constant 0 : i32
    %c0_i32_0 = arith.constant 0 : i32
    return %arg0, %c0_i32 : i32, i32
  }
  func.func @transform_3(%arg0: i32) -> (i32, i32) {
    %c0_i32 = arith.constant 0 : i32
    %c0_i32_0 = arith.constant 0 : i32
    return %arg0, %c0_i32 : i32, i32
  }
}

module attributes {stable_mosaic.version = 11 : i64} {
  func.func @_bn_act_kernel(%arg0: i32, %arg1: memref<512x128xf32, #tpu.memory_space<vmem>>, %arg2: memref<8x128xf32, #tpu.memory_space<vmem>>, %arg3: memref<512x128xbf16, #tpu.memory_space<vmem>>) attributes {dimension_semantics = [#tpu.dimension_semantics<parallel>], iteration_bounds = array<i64: 1>, scalar_prefetch = 0 : i64, scratch_operands = 0 : i64, tpu.core_type = #tpu.core_type<tc>, window_params = [{transform_indices = @transform_0, window_bounds = array<i64: 512, 128>}, {pipeline_mode = #tpu.pipeline_mode<synchronous>, transform_indices = @transform_1, window_bounds = array<i64: 8, 128>}, {transform_indices = @transform_2, window_bounds = array<i64: 512, 128>}]} {
    %c0 = arith.constant 0 : index
    %c0_0 = arith.constant 0 : index
    %0 = vector.load %arg1[%c0, %c0_0] : memref<512x128xf32, #tpu.memory_space<vmem>>, vector<512x128xf32>
    %c0_1 = arith.constant 0 : index
    %c0_2 = arith.constant 0 : index
    %1 = vector.load %arg2[%c0_1, %c0_2] : memref<8x128xf32, #tpu.memory_space<vmem>>, vector<1x128xf32>
    %2 = vector.broadcast %1 : vector<1x128xf32> to vector<512x128xf32>
    %3 = arith.mulf %0, %2 : vector<512x128xf32>
    %c1 = arith.constant 1 : index
    %c0_3 = arith.constant 0 : index
    %4 = vector.load %arg2[%c1, %c0_3] : memref<8x128xf32, #tpu.memory_space<vmem>>, vector<1x128xf32>
    %5 = vector.broadcast %4 : vector<1x128xf32> to vector<512x128xf32>
    %6 = arith.addf %3, %5 : vector<512x128xf32>
    %cst = arith.constant 2.000000e-01 : f32
    %7 = vector.broadcast %cst : f32 to vector<512x128xf32>
    %8 = arith.mulf %7, %6 : vector<512x128xf32>
    %9 = arith.maximumf %6, %8 : vector<512x128xf32>
    %10 = arith.truncf %9 : vector<512x128xf32> to vector<512x128xbf16>
    %c0_4 = arith.constant 0 : index
    %c0_5 = arith.constant 0 : index
    %11 = vector.load %arg3[%c0_4, %c0_5] : memref<512x128xbf16, #tpu.memory_space<vmem>>, vector<512x128xbf16>
    tpu.vector_store %arg3[%c0_4, %c0_5], %10 {strides = array<i32>} : memref<512x128xbf16, #tpu.memory_space<vmem>>, vector<512x128xbf16>,
    return
  }
  func.func @transform_0(%arg0: i32) -> (i32, i32) {
    %c0_i32 = arith.constant 0 : i32
    %c0_i32_0 = arith.constant 0 : i32
    return %arg0, %c0_i32 : i32, i32
  }
  func.func @transform_1(%arg0: i32) -> (i32, i32) {
    %c0_i32 = arith.constant 0 : i32
    %c0_i32_0 = arith.constant 0 : i32
    %c0_i32_1 = arith.constant 0 : i32
    return %c0_i32, %c0_i32_0 : i32, i32
  }
  func.func @transform_2(%arg0: i32) -> (i32, i32) {
    %c0_i32 = arith.constant 0 : i32
    %c0_i32_0 = arith.constant 0 : i32
    return %arg0, %c0_i32 : i32, i32
  }
}

module attributes {stable_mosaic.version = 11 : i64} {
  func.func @_bn_skip_act_kernel(%arg0: i32, %arg1: memref<128x128xf32, #tpu.memory_space<vmem>>, %arg2: memref<128x64xbf16, #tpu.memory_space<vmem>>, %arg3: memref<64x128xbf16, #tpu.memory_space<vmem>>, %arg4: memref<8x128xf32, #tpu.memory_space<vmem>>, %arg5: memref<128x128xf32, #tpu.memory_space<vmem>>) attributes {dimension_semantics = [#tpu.dimension_semantics<parallel>], iteration_bounds = array<i64: 1>, scalar_prefetch = 0 : i64, scratch_operands = 0 : i64, tpu.core_type = #tpu.core_type<tc>, window_params = [{transform_indices = @transform_0, window_bounds = array<i64: 128, 128>}, {transform_indices = @transform_1, window_bounds = array<i64: 128, 64>}, {pipeline_mode = #tpu.pipeline_mode<synchronous>, transform_indices = @transform_2, window_bounds = array<i64: 64, 128>}, {pipeline_mode = #tpu.pipeline_mode<synchronous>, transform_indices = @transform_3, window_bounds = array<i64: 8, 128>}, {transform_indices = @transform_4, window_bounds = array<i64: 128, 128>}]} {
    %c0 = arith.constant 0 : index
    %c0_0 = arith.constant 0 : index
    %0 = vector.load %arg2[%c0, %c0_0] : memref<128x64xbf16, #tpu.memory_space<vmem>>, vector<128x64xbf16>
    %c0_1 = arith.constant 0 : index
    %c0_2 = arith.constant 0 : index
    %1 = vector.load %arg3[%c0_1, %c0_2] : memref<64x128xbf16, #tpu.memory_space<vmem>>, vector<64x128xbf16>
    %cst = arith.constant dense<0.000000e+00> : vector<128x128xf32>
    %2 = tpu.matmul %0, %1, %cst {dimension_numbers = #tpu.dot_dimension_numbers<[1], [0], [0], [1], [0, 0, 1, 1], [], []>} : vector<128x64xbf16>, vector<64x128xbf16>, vector<128x128xf32> -> vector<128x128xf32>
    %c2 = arith.constant 2 : index
    %c0_3 = arith.constant 0 : index
    %3 = vector.load %arg4[%c2, %c0_3] : memref<8x128xf32, #tpu.memory_space<vmem>>, vector<1x128xf32>
    %4 = vector.broadcast %3 : vector<1x128xf32> to vector<128x128xf32>
    %5 = arith.addf %2, %4 : vector<128x128xf32>
    %c0_4 = arith.constant 0 : index
    %c0_5 = arith.constant 0 : index
    %6 = vector.load %arg1[%c0_4, %c0_5] : memref<128x128xf32, #tpu.memory_space<vmem>>, vector<128x128xf32>
    %c0_6 = arith.constant 0 : index
    %c0_7 = arith.constant 0 : index
    %7 = vector.load %arg4[%c0_6, %c0_7] : memref<8x128xf32, #tpu.memory_space<vmem>>, vector<1x128xf32>
    %8 = vector.broadcast %7 : vector<1x128xf32> to vector<128x128xf32>
    %9 = arith.mulf %6, %8 : vector<128x128xf32>
    %c1 = arith.constant 1 : index
    %c0_8 = arith.constant 0 : index
    %10 = vector.load %arg4[%c1, %c0_8] : memref<8x128xf32, #tpu.memory_space<vmem>>, vector<1x128xf32>
    %11 = vector.broadcast %10 : vector<1x128xf32> to vector<128x128xf32>
    %12 = arith.addf %9, %11 : vector<128x128xf32>
    %13 = arith.addf %12, %5 : vector<128x128xf32>
    %cst_9 = arith.constant 2.000000e-01 : f32
    %14 = vector.broadcast %cst_9 : f32 to vector<128x128xf32>
    %15 = arith.mulf %14, %13 : vector<128x128xf32>
    %16 = arith.maximumf %13, %15 : vector<128x128xf32>
    %c0_10 = arith.constant 0 : index
    %c0_11 = arith.constant 0 : index
    %17 = vector.load %arg5[%c0_10, %c0_11] : memref<128x128xf32, #tpu.memory_space<vmem>>, vector<128x128xf32>
    tpu.vector_store %arg5[%c0_10, %c0_11], %16 {strides = array<i32>} : memref<128x128xf32, #tpu.memory_space<vmem>>, vector<128x128xf32>,
    return
  }
  func.func @transform_0(%arg0: i32) -> (i32, i32) {
    %c0_i32 = arith.constant 0 : i32
    %c0_i32_0 = arith.constant 0 : i32
    return %arg0, %c0_i32 : i32, i32
  }
  func.func @transform_1(%arg0: i32) -> (i32, i32) {
    %c0_i32 = arith.constant 0 : i32
    %c0_i32_0 = arith.constant 0 : i32
    return %arg0, %c0_i32 : i32, i32
  }
  func.func @transform_2(%arg0: i32) -> (i32, i32) {
    %c0_i32 = arith.constant 0 : i32
    %c0_i32_0 = arith.constant 0 : i32
    %c0_i32_1 = arith.constant 0 : i32
    return %c0_i32, %c0_i32_0 : i32, i32
  }
  func.func @transform_3(%arg0: i32) -> (i32, i32) {
    %c0_i32 = arith.constant 0 : i32
    %c0_i32_0 = arith.constant 0 : i32
    %c0_i32_1 = arith.constant 0 : i32
    return %c0_i32, %c0_i32_0 : i32, i32
  }
  func.func @transform_4(%arg0: i32) -> (i32, i32) {
    %c0_i32 = arith.constant 0 : i32
    %c0_i32_0 = arith.constant 0 : i32
    return %arg0, %c0_i32 : i32, i32
  }
}

module attributes {stable_mosaic.version = 11 : i64} {
  func.func @_mm_stats_kernel(%arg0: i32, %arg1: memref<128x128xbf16, #tpu.memory_space<vmem>>, %arg2: memref<128x128xbf16, #tpu.memory_space<vmem>>, %arg3: memref<128x128xf32, #tpu.memory_space<vmem>>, %arg4: memref<8x128xf32, #tpu.memory_space<vmem>>) attributes {dimension_semantics = [#tpu.dimension_semantics<parallel>], iteration_bounds = array<i64: 1>, scalar_prefetch = 0 : i64, scratch_operands = 0 : i64, tpu.core_type = #tpu.core_type<tc>, window_params = [{transform_indices = @transform_0, window_bounds = array<i64: 128, 128>}, {pipeline_mode = #tpu.pipeline_mode<synchronous>, transform_indices = @transform_1, window_bounds = array<i64: 128, 128>}, {transform_indices = @transform_2, window_bounds = array<i64: 128, 128>}, {transform_indices = @transform_3, window_bounds = array<i64: 8, 128>}]} {
    %c0 = arith.constant 0 : index
    %c0_0 = arith.constant 0 : index
    %0 = vector.load %arg1[%c0, %c0_0] : memref<128x128xbf16, #tpu.memory_space<vmem>>, vector<128x128xbf16>
    %c0_1 = arith.constant 0 : index
    %c0_2 = arith.constant 0 : index
    %1 = vector.load %arg2[%c0_1, %c0_2] : memref<128x128xbf16, #tpu.memory_space<vmem>>, vector<128x128xbf16>
    %cst = arith.constant dense<0.000000e+00> : vector<128x128xf32>
    %2 = tpu.matmul %0, %1, %cst {dimension_numbers = #tpu.dot_dimension_numbers<[1], [0], [0], [1], [0, 0, 1, 1], [], []>} : vector<128x128xbf16>, vector<128x128xbf16>, vector<128x128xf32> -> vector<128x128xf32>
    %c0_3 = arith.constant 0 : index
    %c0_4 = arith.constant 0 : index
    %3 = vector.load %arg3[%c0_3, %c0_4] : memref<128x128xf32, #tpu.memory_space<vmem>>, vector<128x128xf32>
    tpu.vector_store %arg3[%c0_3, %c0_4], %2 {strides = array<i32>} : memref<128x128xf32, #tpu.memory_space<vmem>>, vector<128x128xf32>,
    %cst_5 = arith.constant 0.000000e+00 : f32
    %4 = vector.broadcast %cst_5 : f32 to vector<8x128xf32>
    %c0_6 = arith.constant 0 : index
    %c0_7 = arith.constant 0 : index
    %5 = vector.load %arg4[%c0_6, %c0_7] : memref<8x128xf32, #tpu.memory_space<vmem>>, vector<8x128xf32>
    tpu.vector_store %arg4[%c0_6, %c0_7], %4 {strides = array<i32>} : memref<8x128xf32, #tpu.memory_space<vmem>>, vector<8x128xf32>,
    %cst_8 = arith.constant dense<0.000000e+00> : vector<128xf32>
    %6 = vector.multi_reduction <add>, %2, %cst_8 [0] : vector<128x128xf32> to vector<128xf32>
    %7 = vector.shape_cast %6 : vector<128xf32> to vector<1x128xf32>
    %c0_9 = arith.constant 0 : index
    %c0_10 = arith.constant 0 : index
    %8 = vector.load %arg4[%c0_9, %c0_10] : memref<8x128xf32, #tpu.memory_space<vmem>>, vector<1x128xf32>
    tpu.vector_store %arg4[%c0_9, %c0_10], %7 {strides = array<i32>} : memref<8x128xf32, #tpu.memory_space<vmem>>, vector<1x128xf32>,
    %9 = arith.mulf %2, %2 : vector<128x128xf32>
    %cst_11 = arith.constant dense<0.000000e+00> : vector<128xf32>
    %10 = vector.multi_reduction <add>, %9, %cst_11 [0] : vector<128x128xf32> to vector<128xf32>
    %11 = vector.shape_cast %10 : vector<128xf32> to vector<1x128xf32>
    %c1 = arith.constant 1 : index
    %c0_12 = arith.constant 0 : index
    %12 = vector.load %arg4[%c1, %c0_12] : memref<8x128xf32, #tpu.memory_space<vmem>>, vector<1x128xf32>
    tpu.vector_store %arg4[%c1, %c0_12], %11 {strides = array<i32>} : memref<8x128xf32, #tpu.memory_space<vmem>>, vector<1x128xf32>,
    return
  }
  func.func @transform_0(%arg0: i32) -> (i32, i32) {
    %c0_i32 = arith.constant 0 : i32
    %c0_i32_0 = arith.constant 0 : i32
    return %arg0, %c0_i32 : i32, i32
  }
  func.func @transform_1(%arg0: i32) -> (i32, i32) {
    %c0_i32 = arith.constant 0 : i32
    %c0_i32_0 = arith.constant 0 : i32
    %c0_i32_1 = arith.constant 0 : i32
    return %c0_i32, %c0_i32_0 : i32, i32
  }
  func.func @transform_2(%arg0: i32) -> (i32, i32) {
    %c0_i32 = arith.constant 0 : i32
    %c0_i32_0 = arith.constant 0 : i32
    return %arg0, %c0_i32 : i32, i32
  }
  func.func @transform_3(%arg0: i32) -> (i32, i32) {
    %c0_i32 = arith.constant 0 : i32
    %c0_i32_0 = arith.constant 0 : i32
    return %arg0, %c0_i32 : i32, i32
  }
}

</mosaic_0001>

<bundles_post_ra>
// kernel: _lambda_.4
= control target key start
LH: loop header
LB: loop body
LE: loop exit
PB: predicated region body
PF: predicated region fallthrough
CT: control target
= control target key end

     0   :  { %vm262_vm0 = vcmask 392192   ;;  %s1675_s1 = inlined_call_operand.vmem [shape: bf16[48,128], index: 1, kind: input, shape index: {}]   ;;  %s1676_s0 = inlined_call_operand.vmem [shape: bf16[512,48], index: 0, kind: input, shape index: {}]   ;;  %s1677_s2 = inlined_call_operand.vmem [shape: f32[512,128], index: 2, kind: output, shape index: {0}]   ;;  %s1678_s3 = inlined_call_operand.vmem [shape: f32[8,128], index: 3, kind: output, shape index: {1}]  }
   0x1   :  { %v1011_v0 = vld [vmem:[%s1675_s1 + $0x10] sm:$0xff]  ;;  %v1010_v1 = vld [vmem:[%s1675_s1 + $0x8] sm:$0xff]  ;;  %v1009_v2 = vld [vmem:[%s1675_s1] sm:$0xff] }
   0x2   :  { %364 = vmatpush.bf16.msra.mxu0 %v1011_v0  ;;  %1012 = vmatpush.bf16.msra.mxu1 %v1011_v0  ;;  %v977_v3 = vld [vmem:[%s1676_s0] sm:$0xff]  ;;  %v978_v5 = vld [vmem:[%s1676_s0 + $0x8] sm:$0xff]  ;;  %v979_v8 = vld [vmem:[%s1676_s0 + $0x10] sm:$0xff] }
   0x3   :  { %1013 = vmatpush.bf16.msra.mxu2 %v1011_v0  ;;  %1014 = vmatpush.bf16.msra.mxu3 %v1011_v0  ;;  %v985_v4 = vld [vmem:[%s1676_s0 + $0x40] sm:$0xff]  ;;  %v986_v6 = vld [vmem:[%s1676_s0 + $0x48] sm:$0xff]  ;;  %v987_v9 = vld [vmem:[%s1676_s0 + $0x50] sm:$0xff] }
   0x4   :  { %v993_v7 = vld [vmem:[%s1676_s0 + $0x80] sm:$0xff]  ;;  %v994_v10 = vld [vmem:[%s1676_s0 + $0x88] sm:$0xff]  ;;  %v980_v11 = vld [vmem:[%s1676_s0 + $0x18] sm:$0xff] }
   0x5   :  { %v988_v12 = vld [vmem:[%s1676_s0 + $0x58] sm:$0xff]  ;;  %v995_v13 = vld [vmem:[%s1676_s0 + $0x90] sm:$0xff]  ;;  %v1001_v14 = vld [vmem:[%s1676_s0 + $0xc0] sm:$0xff] }
   0x6   :  { %365 = vmatpush.bf16.msra.mxu0 %v1010_v1  ;;  %1015 = vmatpush.bf16.msra.mxu1 %v1010_v1  ;;  %v981_v15 = vld [vmem:[%s1676_s0 + $0x20] sm:$0xff]  ;;  %v996_v17 = vld [vmem:[%s1676_s0 + $0x98] sm:$0xff]  ;;  %v1002_v18 = vld [vmem:[%s1676_s0 + $0xc8] sm:$0xff] }
   0x7   :  { %1016 = vmatpush.bf16.msra.mxu2 %v1010_v1  ;;  %1017 = vmatpush.bf16.msra.mxu3 %v1010_v1  ;;  %v989_v16 = vld [vmem:[%s1676_s0 + $0x60] sm:$0xff]  ;;  %v982_v19 = vld [vmem:[%s1676_s0 + $0x28] sm:$0xff]  ;;  %v1003_v22 = vld [vmem:[%s1676_s0 + $0xd0] sm:$0xff] }
   0x8   :  { %v990_v20 = vld [vmem:[%s1676_s0 + $0x68] sm:$0xff]  ;;  %v997_v21 = vld [vmem:[%s1676_s0 + $0xa0] sm:$0xff]  ;;  %v983_v23 = vld [vmem:[%s1676_s0 + $0x30] sm:$0xff] }
   0x9   :  { %v991_v24 = vld [vmem:[%s1676_s0 + $0x70] sm:$0xff]  ;;  %v998_v25 = vld [vmem:[%s1676_s0 + $0xa8] sm:$0xff]  ;;  %v1004_v26 = vld [vmem:[%s1676_s0 + $0xd8] sm:$0xff] }
   0xa   :  { %366 = vmatpush.bf16.msra.mxu0 %v1009_v2  ;;  %1018 = vmatpush.bf16.msra.mxu1 %v1009_v2  ;;  %v984_v27 = vld [vmem:[%s1676_s0 + $0x38] sm:$0xff]  ;;  %v999_v29 = vld [vmem:[%s1676_s0 + $0xb0] sm:$0xff]  ;;  %v1005_v30 = vld [vmem:[%s1676_s0 + $0xe0] sm:$0xff] }
   0xb   :  { %1019 = vmatpush.bf16.msra.mxu2 %v1009_v2  ;;  %1020 = vmatpush.bf16.msra.mxu3 %v1009_v2  ;;  %v992_v28 = vld [vmem:[%s1676_s0 + $0x78] sm:$0xff]  ;;  %v1006_v34 = vld [vmem:[%s1676_s0 + $0xe8] sm:$0xff]  ;;  %v1007_v46 = vld [vmem:[%s1676_s0 + $0xf0] sm:$0xff] }
   0xc   :  { %v1000_v33 = vld [vmem:[%s1676_s0 + $0xb8] sm:$0xff] }
   0xd   :  { %945 = vmatmul.msk.bf16.vlgmr.msra.gmra.mxu0 %vm262_vm0, %v977_v3  ;;  %953 = vmatmul.msk.bf16.vlgmr.msra.gmra.mxu1 %vm262_vm0, %v985_v4  ;;  %v1008_v59 = vld [vmem:[%s1676_s0 + $0xf8] sm:$0xff] }
   0xe   :  { %961 = vmatmul.msk.bf16.vlgmr.msra.gmra.mxu2 %vm262_vm0, %v993_v7  ;;  %969 = vmatmul.msk.bf16.vlgmr.msra.gmra.mxu3 %vm262_vm0, %v1001_v14 }
  0x1d   :  { %946 = vmatmul.msk.bf16.gmra.mxu0 %vm262_vm0, %v978_v5  ;;  %954 = vmatmul.msk.bf16.gmra.mxu1 %vm262_vm0, %v986_v6 }
  0x1e   :  { %962 = vmatmul.msk.bf16.gmra.mxu2 %vm262_vm0, %v994_v10  ;;  %970 = vmatmul.msk.bf16.gmra.mxu3 %vm262_vm0, %v1002_v18 }
  0x2d   :  { %947 = vmatmul.msk.bf16.gmra.mxu0 %vm262_vm0, %v979_v8  ;;  %955 = vmatmul.msk.bf16.gmra.mxu1 %vm262_vm0, %v987_v9 }
  0x2e   :  { %963 = vmatmul.msk.bf16.gmra.mxu2 %vm262_vm0, %v995_v13  ;;  %971 = vmatmul.msk.bf16.gmra.mxu3 %vm262_vm0, %v1003_v22 }
  0x3d   :  { %948 = vmatmul.msk.bf16.gmra.mxu0 %vm262_vm0, %v980_v11  ;;  %956 = vmatmul.msk.bf16.gmra.mxu1 %vm262_vm0, %v988_v12 }
  0x3e   :  { %964 = vmatmul.msk.bf16.gmra.mxu2 %vm262_vm0, %v996_v17  ;;  %972 = vmatmul.msk.bf16.gmra.mxu3 %vm262_vm0, %v1004_v26 }
  0x4d   :  { %949 = vmatmul.msk.bf16.gmra.mxu0 %vm262_vm0, %v981_v15  ;;  %957 = vmatmul.msk.bf16.gmra.mxu1 %vm262_vm0, %v989_v16 }
  0x4e   :  { %965 = vmatmul.msk.bf16.gmra.mxu2 %vm262_vm0, %v997_v21  ;;  %973 = vmatmul.msk.bf16.gmra.mxu3 %vm262_vm0, %v1005_v30 }
  0x5d   :  { %950 = vmatmul.msk.bf16.gmra.mxu0 %vm262_vm0, %v982_v19  ;;  %958 = vmatmul.msk.bf16.gmra.mxu1 %vm262_vm0, %v990_v20 }
  0x5e   :  { %966 = vmatmul.msk.bf16.gmra.mxu2 %vm262_vm0, %v998_v25  ;;  %974 = vmatmul.msk.bf16.gmra.mxu3 %vm262_vm0, %v1006_v34 }
  0x6d   :  { %951 = vmatmul.msk.bf16.gmra.mxu0 %vm262_vm0, %v983_v23  ;;  %959 = vmatmul.msk.bf16.gmra.mxu1 %vm262_vm0, %v991_v24 }
  0x6e   :  { %967 = vmatmul.msk.bf16.gmra.mxu2 %vm262_vm0, %v999_v29  ;;  %975 = vmatmul.msk.bf16.gmra.mxu3 %vm262_vm0, %v1007_v46 }
  0x7d   :  { %952 = vmatmul.msk.bf16.gmra.mxu0 %vm262_vm0, %v984_v27  ;;  %960 = vmatmul.msk.bf16.gmra.mxu1 %vm262_vm0, %v992_v28 }
  0x7e   :  { %968 = vmatmul.msk.bf16.gmra.mxu2 %vm262_vm0, %v1000_v33  ;;  %976 = vmatmul.msk.bf16.gmra.mxu3 %vm262_vm0, %v1008_v59 }
  0x8a   :  { %v368_v31 = vpop.f32.mrf.mxu0  ;;  %v1164_v32 = vpop.f32.mrf.mxu1 }
  0x8b   :  { %528 = vst [vmem:[%s1677_s2] sm:$0xff] %v368_v31  ;;  %v663_v37 = vmul.f32 %v368_v31, %v368_v31 }
  0x8c   :  { %544 = vst [vmem:[%s1677_s2 + $0x80] sm:$0xff] %v1164_v32 }
  0x91   :  { %v1208_v51 = vpop.f32.mrf.mxu2  ;;  %v1278_v5 = vpop.f32.mrf.mxu3 }
  0x92   :  { %v370_v35 = vpop.f32.mrf.mxu0  ;;  %v1181_v36 = vpop.f32.mrf.mxu1  ;;  %560 = vst [vmem:[%s1677_s2 + $0x100] sm:$0xff] %v1208_v51 }
  0x93   :  { %529 = vst [vmem:[%s1677_s2 + $0x8] sm:$0xff] %v370_v35  ;;  %v593_v38 = vadd.f32 %v370_v35, %v368_v31  ;;  %v664_v39 = vmul.f32 %v370_v35, %v370_v35 }
  0x94   :  { %545 = vst [vmem:[%s1677_s2 + $0x88] sm:$0xff] %v1181_v36 }
  0x95   :  { %v727_v40 = vadd.f32 %v664_v39, %v663_v37  ;;  %576 = vst [vmem:[%s1677_s2 + $0x180] sm:$0xff] %v1278_v5 }
  0x99   :  { %v1225_v57 = vpop.f32.mrf.mxu2  ;;  %v1299_v9 = vpop.f32.mrf.mxu3 }
  0x9a   :  { %v373_v41 = vpop.f32.mrf.mxu0  ;;  %v1190_v42 = vpop.f32.mrf.mxu1  ;;  %561 = vst [vmem:[%s1677_s2 + $0x108] sm:$0xff] %v1225_v57 }
  0x9b   :  { %530 = vst [vmem:[%s1677_s2 + $0x10] sm:$0xff] %v373_v41  ;;  %v594_v43 = vadd.f32 %v593_v38, %v373_v41  ;;  %v665_v44 = vmul.f32 %v373_v41, %v373_v41 }
  0x9c   :  { %546 = vst [vmem:[%s1677_s2 + $0x90] sm:$0xff] %v1190_v42 }
  0x9d   :  { %v728_v45 = vadd.f32 %v727_v40, %v665_v44  ;;  %577 = vst [vmem:[%s1677_s2 + $0x188] sm:$0xff] %v1299_v9 }
  0xa1   :  { %v1246_v62 = vpop.f32.mrf.mxu2  ;;  %v1320_v13 = vpop.f32.mrf.mxu3 }
  0xa2   :  { %v375_v47 = vpop.f32.mrf.mxu0  ;;  %v1203_v48 = vpop.f32.mrf.mxu1  ;;  %562 = vst [vmem:[%s1677_s2 + $0x110] sm:$0xff] %v1246_v62 }
  0xa3   :  { %531 = vst [vmem:[%s1677_s2 + $0x18] sm:$0xff] %v375_v47  ;;  %v595_v49 = vadd.f32 %v594_v43, %v375_v47  ;;  %v666_v50 = vmul.f32 %v375_v47, %v375_v47 }
  0xa4   :  { %547 = vst [vmem:[%s1677_s2 + $0x98] sm:$0xff] %v1203_v48 }
  0xa5   :  { %v729_v52 = vadd.f32 %v728_v45, %v666_v50  ;;  %578 = vst [vmem:[%s1677_s2 + $0x190] sm:$0xff] %v1320_v13 }
  0xa9   :  { %v1261_v1 = vpop.f32.mrf.mxu2  ;;  %v1341_v17 = vpop.f32.mrf.mxu3 }
  0xaa   :  { %v378_v53 = vpop.f32.mrf.mxu0  ;;  %v1218_v54 = vpop.f32.mrf.mxu1  ;;  %563 = vst [vmem:[%s1677_s2 + $0x118] sm:$0xff] %v1261_v1 }
  0xab   :  { %532 = vst [vmem:[%s1677_s2 + $0x20] sm:$0xff] %v378_v53  ;;  %v1223_v55 = vadd.f32 %v595_v49, %v378_v53  ;;  %v667_v56 = vmul.f32 %v378_v53, %v378_v53 }
  0xac   :  { %548 = vst [vmem:[%s1677_s2 + $0xa0] sm:$0xff] %v1218_v54 }
  0xad   :  { %v1231_v58 = vadd.f32 %v729_v52, %v667_v56  ;;  %579 = vst [vmem:[%s1677_s2 + $0x198] sm:$0xff] %v1341_v17 }
  0xb1   :  { %v1276_v4 = vpop.f32.mrf.mxu2  ;;  %v1362_v21 = vpop.f32.mrf.mxu3 }
  0xb2   :  { %v380_v60 = vpop.f32.mrf.mxu0  ;;  %v1241_v61 = vpop.f32.mrf.mxu1  ;;  %564 = vst [vmem:[%s1677_s2 + $0x120] sm:$0xff] %v1276_v4 }
  0xb3   :  { %533 = vst [vmem:[%s1677_s2 + $0x28] sm:$0xff] %v380_v60  ;;  %v668_v26 = vmul.f32 %v380_v60, %v380_v60  ;;  %v597_v27 = vadd.f32 %v1223_v55, %v380_v60 }
  0xb4   :  { %549 = vst [vmem:[%s1677_s2 + $0xa8] sm:$0xff] %v1241_v61 }
  0xb5   :  { %580 = vst [vmem:[%s1677_s2 + $0x1a0] sm:$0xff] %v1362_v21  ;;  %v731_v29 = vadd.f32 %v1231_v58, %v668_v26 }
  0xb9   :  { %v1297_v8 = vpop.f32.mrf.mxu2  ;;  %v1383_v25 = vpop.f32.mrf.mxu3 }
  0xba   :  { %v383_v63 = vpop.f32.mrf.mxu0  ;;  %v1256_v0 = vpop.f32.mrf.mxu1  ;;  %565 = vst [vmem:[%s1677_s2 + $0x128] sm:$0xff] %v1297_v8 }
  0xbb   :  { %534 = vst [vmem:[%s1677_s2 + $0x30] sm:$0xff] %v383_v63  ;;  %v669_v28 = vmul.f32 %v383_v63, %v383_v63  ;;  %v598_v30 = vadd.f32 %v597_v27, %v383_v63 }
  0xbc   :  { %550 = vst [vmem:[%s1677_s2 + $0xb0] sm:$0xff] %v1256_v0 }
  0xbd   :  { %581 = vst [vmem:[%s1677_s2 + $0x1a8] sm:$0xff] %v1383_v25  ;;  %v732_v35 = vadd.f32 %v731_v29, %v669_v28 }
  0xc1   :  { %v1318_v12 = vpop.f32.mrf.mxu2  ;;  %v1406_v40 = vpop.f32.mrf.mxu3 }
  0xc2   :  { %v385_v2 = vpop.f32.mrf.mxu0  ;;  %v1271_v3 = vpop.f32.mrf.mxu1  ;;  %566 = vst [vmem:[%s1677_s2 + $0x130] sm:$0xff] %v1318_v12 }
  0xc3   :  { %535 = vst [vmem:[%s1677_s2 + $0x38] sm:$0xff] %v385_v2  ;;  %v670_v31 = vmul.f32 %v385_v2, %v385_v2  ;;  %v599_v37 = vadd.f32 %v598_v30, %v385_v2 }
  0xc4   :  { %551 = vst [vmem:[%s1677_s2 + $0xb8] sm:$0xff] %v1271_v3 }
  0xc5   :  { %v733_v41 = vadd.f32 %v732_v35, %v670_v31  ;;  %582 = vst [vmem:[%s1677_s2 + $0x1b0] sm:$0xff] %v1406_v40 }
  0xc9   :  { %v1339_v16 = vpop.f32.mrf.mxu2  ;;  %v1427_v63 = vpop.f32.mrf.mxu3 }
  0xca   :  { %v388_v6 = vpop.f32.mrf.mxu0  ;;  %v1292_v7 = vpop.f32.mrf.mxu1  ;;  %567 = vst [vmem:[%s1677_s2 + $0x138] sm:$0xff] %v1339_v16 }
  0xcb   :  { %536 = vst [vmem:[%s1677_s2 + $0x40] sm:$0xff] %v388_v6  ;;  %v671_v38 = vmul.f32 %v388_v6, %v388_v6  ;;  %v600_v43 = vadd.f32 %v599_v37, %v388_v6 }
  0xcc   :  { %552 = vst [vmem:[%s1677_s2 + $0xc0] sm:$0xff] %v1292_v7 }
  0xcd   :  { %v734_v45 = vadd.f32 %v733_v41, %v671_v38  ;;  %583 = vst [vmem:[%s1677_s2 + $0x1b8] sm:$0xff] %v1427_v63 }
  0xd1   :  { %v1360_v20 = vpop.f32.mrf.mxu2  ;;  %v1448_v38 = vpop.f32.mrf.mxu3 }
  0xd2   :  { %v390_v10 = vpop.f32.mrf.mxu0  ;;  %v1313_v11 = vpop.f32.mrf.mxu1  ;;  %568 = vst [vmem:[%s1677_s2 + $0x140] sm:$0xff] %v1360_v20 }
  0xd3   :  { %537 = vst [vmem:[%s1677_s2 + $0x48] sm:$0xff] %v390_v10  ;;  %v672_v44 = vmul.f32 %v390_v10, %v390_v10  ;;  %v601_v46 = vadd.f32 %v600_v43, %v390_v10 }
  0xd4   :  { %553 = vst [vmem:[%s1677_s2 + $0xc8] sm:$0xff] %v1313_v11 }
  0xd5   :  { %v735_v49 = vadd.f32 %v734_v45, %v672_v44  ;;  %584 = vst [vmem:[%s1677_s2 + $0x1c0] sm:$0xff] %v1448_v38  ;;  %v680_v44 = vmul.f32 %v1181_v36, %v1181_v36 }
  0xd9   :  { %v1381_v24 = vpop.f32.mrf.mxu2 }
  0xda   :  { %v393_v14 = vpop.f32.mrf.mxu0  ;;  %v1334_v15 = vpop.f32.mrf.mxu1  ;;  %569 = vst [vmem:[%s1677_s2 + $0x148] sm:$0xff] %v1381_v24 }
  0xdb   :  { %538 = vst [vmem:[%s1677_s2 + $0x50] sm:$0xff] %v393_v14  ;;  %v673_v47 = vmul.f32 %v393_v14, %v393_v14  ;;  %v602_v50 = vadd.f32 %v601_v46, %v393_v14 }
  0xdc   :  { %554 = vst [vmem:[%s1677_s2 + $0xd0] sm:$0xff] %v1334_v15 }
  0xdd   :  { %v736_v56 = vadd.f32 %v735_v49, %v673_v47 }
  0xe1   :  { %v1404_v39 = vpop.f32.mrf.mxu2 }
  0xe2   :  { %v395_v18 = vpop.f32.mrf.mxu0  ;;  %v1355_v19 = vpop.f32.mrf.mxu1  ;;  %570 = vst [vmem:[%s1677_s2 + $0x150] sm:$0xff] %v1404_v39 }
  0xe3   :  { %539 = vst [vmem:[%s1677_s2 + $0x58] sm:$0xff] %v395_v18  ;;  %v674_v52 = vmul.f32 %v395_v18, %v395_v18  ;;  %v603_v58 = vadd.f32 %v602_v50, %v395_v18  ;;  %v682_v50 = vmul.f32 %v1203_v48, %v1203_v48 }
  0xe4   :  { %555 = vst [vmem:[%s1677_s2 + $0xd8] sm:$0xff] %v1355_v19 }
  0xe5   :  { %v737_v2 = vadd.f32 %v736_v56, %v674_v52 }
  0xe9   :  { %v1425_v60 = vpop.f32.mrf.mxu2 }
  0xea   :  { %v398_v22 = vpop.f32.mrf.mxu0  ;;  %v1376_v23 = vpop.f32.mrf.mxu1  ;;  %571 = vst [vmem:[%s1677_s2 + $0x158] sm:$0xff] %v1425_v60 }
  0xeb   :  { %540 = vst [vmem:[%s1677_s2 + $0x60] sm:$0xff] %v398_v22  ;;  %v675_v59 = vmul.f32 %v398_v22, %v398_v22  ;;  %v604_v6 = vadd.f32 %v603_v58, %v398_v22  ;;  %v1476_v58 = vpop.f32.mrf.mxu3 }
  0xec   :  { %556 = vst [vmem:[%s1677_s2 + $0xe0] sm:$0xff] %v1376_v23 }
  0xed   :  { %v738_v14 = vadd.f32 %v737_v2, %v675_v59  ;;  %585 = vst [vmem:[%s1677_s2 + $0x1c8] sm:$0xff] %v1476_v58 }
  0xf1   :  { %v1446_v37 = vpop.f32.mrf.mxu2 }
  0xf2   :  { %v400_v33 = vpop.f32.mrf.mxu0  ;;  %v1399_v34 = vpop.f32.mrf.mxu1  ;;  %572 = vst [vmem:[%s1677_s2 + $0x160] sm:$0xff] %v1446_v37 }
  0xf3   :  { %541 = vst [vmem:[%s1677_s2 + $0x68] sm:$0xff] %v400_v33  ;;  %v676_v10 = vmul.f32 %v400_v33, %v400_v33  ;;  %v605_v18 = vadd.f32 %v604_v6, %v400_v33  ;;  %v679_v33 = vmul.f32 %v1164_v32, %v1164_v32 }
  0xf4   :  { %557 = vst [vmem:[%s1677_s2 + $0xe8] sm:$0xff] %v1399_v34 }
  0xf5   :  { %v739_v27 = vadd.f32 %v738_v14, %v676_v10  ;;  %v685_v10 = vmul.f32 %v1256_v0, %v1256_v0 }
  0xf9   :  { %v1474_v56 = vpop.f32.mrf.mxu2 }
  0xfa   :  { %v403_v53 = vpop.f32.mrf.mxu0  ;;  %v1420_v55 = vpop.f32.mrf.mxu1  ;;  %573 = vst [vmem:[%s1677_s2 + $0x168] sm:$0xff] %v1474_v56 }
  0xfb   :  { %542 = vst [vmem:[%s1677_s2 + $0x70] sm:$0xff] %v403_v53  ;;  %v677_v26 = vmul.f32 %v403_v53, %v403_v53  ;;  %v606_v28 = vadd.f32 %v605_v18, %v403_v53 }
  0xfc   :  { %558 = vst [vmem:[%s1677_s2 + $0xf0] sm:$0xff] %v1420_v55 }
  0xfd   :  { %v740_v22 = vadd.f32 %v739_v27, %v677_v26 }
 0x102   :  { %v405_v29 = vpop.f32.mrf.mxu0  ;;  %v1441_v30 = vpop.f32.mrf.mxu1 }
 0x103   :  { %543 = vst [vmem:[%s1677_s2 + $0x78] sm:$0xff] %v405_v29  ;;  %v607_v31 = vadd.f32 %v606_v28, %v405_v29  ;;  %v678_v35 = vmul.f32 %v405_v29, %v405_v29  ;;  %v1498_v28 = vpop.f32.mrf.mxu2  ;;  %v1500_v29 = vpop.f32.mrf.mxu3 }
 0x104   :  { %559 = vst [vmem:[%s1677_s2 + $0xf8] sm:$0xff] %v1441_v30 }
 0x105   :  { %v608_v41 = vadd.f32 %v607_v31, %v1164_v32  ;;  %v741_v43 = vadd.f32 %v740_v22, %v678_v35  ;;  %v681_v32 = vmul.f32 %v1190_v42, %v1190_v42  ;;  %574 = vst [vmem:[%s1677_s2 + $0x170] sm:$0xff] %v1498_v28 }
 0x106   :  { %586 = vst [vmem:[%s1677_s2 + $0x1d0] sm:$0xff] %v1500_v29 }
 0x107   :  { %v609_v45 = vadd.f32 %v608_v41, %v1181_v36  ;;  %v742_v46 = vadd.f32 %v741_v43, %v679_v33  ;;  %v683_v36 = vmul.f32 %v1218_v54, %v1218_v54  ;;  %v689_v33 = vmul.f32 %v1334_v15, %v1334_v15 }
 0x109   :  { %v610_v47 = vadd.f32 %v609_v45, %v1190_v42  ;;  %v743_v49 = vadd.f32 %v742_v46, %v680_v44 }
 0x10b   :  { %v611_v52 = vadd.f32 %v610_v47, %v1203_v48  ;;  %v744_v53 = vadd.f32 %v743_v49, %v681_v32  ;;  %v684_v48 = vmul.f32 %v1241_v61, %v1241_v61  ;;  %v1522_v46 = vpop.f32.mrf.mxu2  ;;  %v1524_v32 = vpop.f32.mrf.mxu3 }
 0x10c   :  { %575 = vst [vmem:[%s1677_s2 + $0x178] sm:$0xff] %v1522_v46 }
 0x10d   :  { %v612_v42 = vadd.f32 %v611_v52, %v1218_v54  ;;  %v745_v59 = vadd.f32 %v744_v53, %v682_v50  ;;  %v686_v54 = vmul.f32 %v1271_v3, %v1271_v3  ;;  %587 = vst [vmem:[%s1677_s2 + $0x1d8] sm:$0xff] %v1524_v32  ;;  %v692_v50 = vmul.f32 %v1399_v34, %v1399_v34 }
 0x10f   :  { %v613_v2 = vadd.f32 %v612_v42, %v1241_v61  ;;  %v746_v6 = vadd.f32 %v745_v59, %v683_v36  ;;  %v687_v61 = vmul.f32 %v1292_v7, %v1292_v7  ;;  %v693_v36 = vmul.f32 %v1420_v55, %v1420_v55 }
 0x110   :  { %v694_v59 = vmul.f32 %v1441_v30, %v1441_v30 }
 0x111   :  { %v747_v14 = vadd.f32 %v746_v6, %v684_v48  ;;  %v614_v18 = vadd.f32 %v613_v2, %v1256_v0 }
 0x113   :  { %v615_v26 = vadd.f32 %v614_v18, %v1271_v3  ;;  %v748_v27 = vadd.f32 %v747_v14, %v685_v10  ;;  %v688_v3 = vmul.f32 %v1313_v11, %v1313_v11  ;;  %v1546_v48 = vpop.f32.mrf.mxu3 }
 0x114   :  { %588 = vst [vmem:[%s1677_s2 + $0x1e0] sm:$0xff] %v1546_v48 }
 0x115   :  { %v616_v0 = vadd.f32 %v615_v26, %v1292_v7  ;;  %v749_v22 = vadd.f32 %v748_v27, %v686_v54  ;;  %v690_v7 = vmul.f32 %v1355_v19, %v1355_v19  ;;  %v698_v26 = vmul.f32 %v1261_v1, %v1261_v1 }
 0x117   :  { %v617_v31 = vadd.f32 %v616_v0, %v1313_v11  ;;  %v750_v35 = vadd.f32 %v749_v22, %v687_v61  ;;  %v700_v22 = vmul.f32 %v1297_v8, %v1297_v8 }
 0x119   :  { %v618_v41 = vadd.f32 %v617_v31, %v1334_v15  ;;  %v751_v43 = vadd.f32 %v750_v35, %v688_v3  ;;  %v691_v15 = vmul.f32 %v1376_v23, %v1376_v23  ;;  %v701_v31 = vmul.f32 %v1318_v12, %v1318_v12 }
 0x11b   :  { %v619_v44 = vadd.f32 %v618_v41, %v1355_v19  ;;  %v752_v45 = vadd.f32 %v751_v43, %v689_v33  ;;  %v702_v41 = vmul.f32 %v1339_v16, %v1339_v16 }
 0x11d   :  { %v620_v11 = vadd.f32 %v619_v44, %v1376_v23  ;;  %v753_v47 = vadd.f32 %v752_v45, %v690_v7 }
 0x11f   :  { %v754_v19 = vadd.f32 %v753_v47, %v691_v15  ;;  %v621_v49 = vadd.f32 %v620_v11, %v1399_v34  ;;  %v695_v34 = vmul.f32 %v1208_v51, %v1208_v51  ;;  %v705_v15 = vmul.f32 %v1404_v39, %v1404_v39 }
 0x121   :  { %v755_v52 = vadd.f32 %v754_v19, %v692_v50  ;;  %v622_v53 = vadd.f32 %v621_v49, %v1420_v55  ;;  %v696_v55 = vmul.f32 %v1225_v57, %v1225_v57  ;;  %v706_v50 = vmul.f32 %v1425_v60, %v1425_v60 }
 0x123   :  { %v756_v42 = vadd.f32 %v755_v52, %v693_v36  ;;  %v623_v23 = vadd.f32 %v622_v53, %v1441_v30  ;;  %v697_v30 = vmul.f32 %v1246_v62, %v1246_v62 }
 0x125   :  { %v624_v2 = vadd.f32 %v623_v23, %v1208_v51  ;;  %v757_v6 = vadd.f32 %v756_v42, %v694_v59  ;;  %v1564_v51 = vpop.f32.mrf.mxu3 }
 0x126   :  { %589 = vst [vmem:[%s1677_s2 + $0x1e8] sm:$0xff] %v1564_v51 }
 0x127   :  { %v625_v10 = vadd.f32 %v624_v2, %v1225_v57  ;;  %v758_v14 = vadd.f32 %v757_v6, %v695_v34  ;;  %v699_v57 = vmul.f32 %v1276_v4, %v1276_v4  ;;  %v709_v34 = vmul.f32 %v1498_v28, %v1498_v28 }
 0x129   :  { %v626_v18 = vadd.f32 %v625_v10, %v1246_v62  ;;  %v759_v54 = vadd.f32 %v758_v14, %v696_v55  ;;  %v710_v55 = vmul.f32 %v1522_v46, %v1522_v46  ;;  %v1022_v10 = vmov 0.0  }
 0x12a   :  { %592 = vst [vmem:[%s1678_s3] sm:$0xff] %v1022_v10 }
 0x12b   :  { %v627_v27 = vadd.f32 %v626_v18, %v1261_v1  ;;  %v760_v61 = vadd.f32 %v759_v54, %v697_v30 }
 0x12d   :  { %v628_v0 = vadd.f32 %v627_v27, %v1276_v4  ;;  %v761_v62 = vadd.f32 %v760_v61, %v698_v26  ;;  %v1582_v4 = vpop.f32.mrf.mxu3  ;;  %v714_v27 = vmul.f32 %v1341_v17, %v1341_v17 }
 0x12e   :  { %590 = vst [vmem:[%s1677_s2 + $0x1f0] sm:$0xff] %v1582_v4 }
 0x12f   :  { %v629_v3 = vadd.f32 %v628_v0, %v1297_v8  ;;  %v762_v1 = vadd.f32 %v761_v62, %v699_v57  ;;  %v703_v8 = vmul.f32 %v1360_v20, %v1360_v20 }
 0x131   :  { %v763_v35 = vadd.f32 %v762_v1, %v700_v22  ;;  %v630_v33 = vadd.f32 %v629_v3, %v1318_v12  ;;  %v704_v12 = vmul.f32 %v1381_v24, %v1381_v24 }
 0x133   :  { %v631_v43 = vadd.f32 %v630_v33, %v1339_v16  ;;  %v764_v7 = vadd.f32 %v763_v35, %v701_v31 }
 0x135   :  { %v632_v44 = vadd.f32 %v631_v43, %v1360_v20  ;;  %v765_v45 = vadd.f32 %v764_v7, %v702_v41  ;;  %v1600_v20 = vpop.f32.mrf.mxu3 }
 0x136   :  { %591 = vst [vmem:[%s1677_s2 + $0x1f8] sm:$0xff] %v1600_v20 }
 0x137   :  { %v633_v11 = vadd.f32 %v632_v44, %v1381_v24  ;;  %v766_v16 = vadd.f32 %v765_v45, %v703_v8 }
 0x139   :  { %v634_v47 = vadd.f32 %v633_v11, %v1404_v39  ;;  %v767_v19 = vadd.f32 %v766_v16, %v704_v12  ;;  %v707_v39 = vmul.f32 %v1446_v37, %v1446_v37  ;;  %v722_v12 = vmul.f32 %v1524_v32, %v1524_v32 }
 0x13b   :  { %v635_v49 = vadd.f32 %v634_v47, %v1425_v60  ;;  %v768_v52 = vadd.f32 %v767_v19, %v705_v15  ;;  %v708_v60 = vmul.f32 %v1474_v56, %v1474_v56  ;;  %v723_v15 = vmul.f32 %v1546_v48, %v1546_v48 }
 0x13c   :  { %v724_v19 = vmul.f32 %v1564_v51, %v1564_v51 }
 0x13d   :  { %v769_v24 = vadd.f32 %v768_v52, %v706_v50  ;;  %v636_v53 = vadd.f32 %v635_v49, %v1446_v37  ;;  %v711_v37 = vmul.f32 %v1278_v5, %v1278_v5  ;;  %v725_v50 = vmul.f32 %v1582_v4, %v1582_v4 }
 0x13f   :  { %v770_v36 = vadd.f32 %v769_v24, %v707_v39  ;;  %v637_v42 = vadd.f32 %v636_v53, %v1474_v56  ;;  %v726_v24 = vmul.f32 %v1600_v20, %v1600_v20 }
 0x141   :  { %v771_v23 = vadd.f32 %v770_v36, %v708_v60  ;;  %v638_v59 = vadd.f32 %v637_v42, %v1498_v28  ;;  %v712_v28 = vmul.f32 %v1299_v9, %v1299_v9 }
 0x143   :  { %v772_v2 = vadd.f32 %v771_v23, %v709_v34  ;;  %v639_v6 = vadd.f32 %v638_v59, %v1522_v46  ;;  %v713_v46 = vmul.f32 %v1320_v13, %v1320_v13 }
 0x145   :  { %v640_v56 = vadd.f32 %v639_v6, %v1278_v5  ;;  %v773_v14 = vadd.f32 %v772_v2, %v710_v55  ;;  %v715_v5 = vmul.f32 %v1362_v21, %v1362_v21 }
 0x147   :  { %v641_v30 = vadd.f32 %v640_v56, %v1299_v9  ;;  %v774_v18 = vadd.f32 %v773_v14, %v711_v37  ;;  %v716_v9 = vmul.f32 %v1383_v25, %v1383_v25 }
 0x149   :  { %v642_v54 = vadd.f32 %v641_v30, %v1320_v13  ;;  %v775_v26 = vadd.f32 %v774_v18, %v712_v28  ;;  %v717_v13 = vmul.f32 %v1406_v40, %v1406_v40 }
 0x14b   :  { %v643_v61 = vadd.f32 %v642_v54, %v1341_v17  ;;  %v776_v57 = vadd.f32 %v775_v26, %v713_v46  ;;  %v718_v17 = vmul.f32 %v1427_v63, %v1427_v63 }
 0x14d   :  { %v644_v0 = vadd.f32 %v643_v61, %v1362_v21  ;;  %v777_v62 = vadd.f32 %v776_v57, %v714_v27  ;;  %v719_v21 = vmul.f32 %v1448_v38, %v1448_v38 }
 0x14f   :  { %v645_v22 = vadd.f32 %v644_v0, %v1383_v25  ;;  %v778_v3 = vadd.f32 %v777_v62, %v715_v5  ;;  %v720_v25 = vmul.f32 %v1476_v58, %v1476_v58 }
 0x151   :  { %v779_v1 = vadd.f32 %v778_v3, %v716_v9  ;;  %v646_v31 = vadd.f32 %v645_v22, %v1406_v40  ;;  %v721_v40 = vmul.f32 %v1500_v29, %v1500_v29 }
 0x153   :  { %v647_v35 = vadd.f32 %v646_v31, %v1427_v63  ;;  %v780_v33 = vadd.f32 %v779_v1, %v717_v13 }
 0x155   :  { %v648_v41 = vadd.f32 %v647_v35, %v1448_v38  ;;  %v781_v43 = vadd.f32 %v780_v33, %v718_v17 }
 0x157   :  { %v649_v7 = vadd.f32 %v648_v41, %v1476_v58  ;;  %v782_v8 = vadd.f32 %v781_v43, %v719_v21 }
 0x159   :  { %v650_v44 = vadd.f32 %v649_v7, %v1500_v29  ;;  %v783_v45 = vadd.f32 %v782_v8, %v720_v25 }
 0x15b   :  { %v651_v63 = vadd.f32 %v650_v44, %v1524_v32  ;;  %v784_v11 = vadd.f32 %v783_v45, %v721_v40 }
 0x15d   :  { %v785_v38 = vadd.f32 %v784_v11, %v722_v12  ;;  %v652_v16 = vadd.f32 %v651_v63, %v1546_v48 }
 0x15f   :  { %v786_v58 = vadd.f32 %v785_v38, %v723_v15  ;;  %v653_v47 = vadd.f32 %v652_v16, %v1564_v51 }
 0x161   :  { %v787_v29 = vadd.f32 %v786_v58, %v724_v19  ;;  %v654_v49 = vadd.f32 %v653_v47, %v1582_v4 }
 0x163   :  { %v788_v32 = vadd.f32 %v787_v29, %v725_v50  ;;  %v655_v52 = vadd.f32 %v654_v49, %v1600_v20 }
 0x165   :  { %v656_v53 = vrot.slane %v655_v52, 4  ;;  %v789_v48 = vadd.f32 %v788_v32, %v726_v24 }
 0x167   :  { %v657_v39 = vadd.f32 %v656_v53, %v655_v52  ;;  %v790_v36 = vrot.slane %v789_v48, 4 }
 0x169   :  { %v658_v42 = vrot.slane %v657_v39, 2  ;;  %v791_v60 = vadd.f32 %v790_v36, %v789_v48 }
 0x16b   :  { %v659_v23 = vadd.f32 %v658_v42, %v657_v39  ;;  %v792_v51 = vrot.slane %v791_v60, 2 }
 0x16d   :  { %v660_v59 = vrot.slane %v659_v23, 1  ;;  %v793_v34 = vadd.f32 %v792_v51, %v791_v60 }
 0x16f   :  { %v661_v2 = vadd.f32 %v660_v59, %v659_v23  ;;  %v794_v6 = vrot.slane %v793_v34, 1 }
 0x171   :  { %662 = vst [vmem:[%s1678_s3] sm:$0x1] %v661_v2  ;;  %v795_v4 = vadd.f32 %v794_v6, %v793_v34 }
 0x173   :  { %796 = vst [vmem:[%s1678_s3 + $0x1] sm:$0x1] %v795_v4 }

// kernel: _lambda_.5
= control target key start
LH: loop header
LB: loop body
LE: loop exit
PB: predicated region body
PF: predicated region fallthrough
CT: control target
= control target key end

     0   :  { %s1101_s0 = inlined_call_operand.vmem [shape: f32[512,128], index: 0, kind: input, shape index: {}]   ;;  %s1102_s1 = inlined_call_operand.vmem [shape: f32[8,128], index: 1, kind: input, shape index: {}]   ;;  %s1103_s2 = inlined_call_operand.vmem [shape: bf16[512,128], index: 2, kind: output, shape index: {}]  }
   0x1   :  { %v11_v0 = vld [vmem:[%s1101_s0] sm:$0xff]  ;;  %v12_v1 = vld [vmem:[%s1101_s0 + $0x8] sm:$0xff]  ;;  %v13_v4 = vld [vmem:[%s1101_s0 + $0x10] sm:$0xff] }
   0x2   :  { %v684_v2 = vld [vmem:[%s1102_s1] ss:$0 sm:$0xff]  ;;  %v689_v3 = vld [vmem:[%s1102_s1 + $0x1] ss:$0 sm:$0xff]  ;;  %v14_v5 = vld [vmem:[%s1101_s0 + $0x18] sm:$0xff] }
   0x3   :  { %v15_v6 = vld [vmem:[%s1101_s0 + $0x20] sm:$0xff]  ;;  %v77_v7 = vmul.f32 %v684_v2, %v11_v0  ;;  %v78_v8 = vmul.f32 %v684_v2, %v12_v1  ;;  %v79_v9 = vmul.f32 %v684_v2, %v13_v4  ;;  %v80_v10 = vmul.f32 %v684_v2, %v14_v5  ;;  %v16_v11 = vld [vmem:[%s1101_s0 + $0x28] sm:$0xff]  ;;  %v17_v12 = vld [vmem:[%s1101_s0 + $0x30] sm:$0xff] }
   0x4   :  { %v18_v13 = vld [vmem:[%s1101_s0 + $0x38] sm:$0xff]  ;;  %v81_v14 = vmul.f32 %v684_v2, %v15_v6  ;;  %v82_v15 = vmul.f32 %v684_v2, %v16_v11  ;;  %v83_v16 = vmul.f32 %v684_v2, %v17_v12  ;;  %v19_v18 = vld [vmem:[%s1101_s0 + $0x40] sm:$0xff]  ;;  %v20_v23 = vld [vmem:[%s1101_s0 + $0x48] sm:$0xff] }
   0x5   :  { %v84_v17 = vmul.f32 %v684_v2, %v18_v13  ;;  %v143_v19 = vadd.f32 %v689_v3, %v77_v7  ;;  %v144_v20 = vadd.f32 %v689_v3, %v78_v8  ;;  %v145_v21 = vadd.f32 %v689_v3, %v79_v9  ;;  %v21_v40 = vld [vmem:[%s1101_s0 + $0x50] sm:$0xff]  ;;  %v22_v45 = vld [vmem:[%s1101_s0 + $0x58] sm:$0xff]  ;;  %v23_v46 = vld [vmem:[%s1101_s0 + $0x60] sm:$0xff] }
   0x6   :  { %v146_v22 = vadd.f32 %v689_v3, %v80_v10  ;;  %v147_v24 = vadd.f32 %v689_v3, %v81_v14  ;;  %v148_v25 = vadd.f32 %v689_v3, %v82_v15  ;;  %v149_v26 = vadd.f32 %v689_v3, %v83_v16  ;;  %v24_v51 = vld [vmem:[%s1101_s0 + $0x68] sm:$0xff]  ;;  %v25_v52 = vld [vmem:[%s1101_s0 + $0x70] sm:$0xff]  ;;  %v26_v61 = vld [vmem:[%s1101_s0 + $0x78] sm:$0xff] }
   0x7   :  { %v150_v27 = vadd.f32 %v689_v3, %v84_v17  ;;  %v207_v28 = vmul.f32 0.2, %v143_v19  ;;  %v208_v29 = vmul.f32 0.2, %v144_v20  ;;  %v209_v30 = vmul.f32 0.2, %v145_v21 }
   0x8   :  { %v85_v31 = vmul.f32 %v684_v2, %v19_v18  ;;  %v210_v32 = vmul.f32 0.2, %v146_v22  ;;  %v211_v33 = vmul.f32 0.2, %v147_v24  ;;  %v212_v34 = vmul.f32 0.2, %v148_v25 }
   0x9   :  { %v86_v35 = vmul.f32 %v684_v2, %v20_v23  ;;  %v271_v36 = vmax.f32 %v143_v19, %v207_v28  ;;  %v272_v37 = vmax.f32 %v144_v20, %v208_v29  ;;  %v273_v38 = vmax.f32 %v145_v21, %v209_v30  ;;  %v27_v4 = vld [vmem:[%s1101_s0 + $0x80] sm:$0xff]  ;;  %v28_v13 = vld [vmem:[%s1101_s0 + $0x88] sm:$0xff]  ;;  %v29_v18 = vld [vmem:[%s1101_s0 + $0x90] sm:$0xff] }
   0xa   :  { %v213_v39 = vmul.f32 0.2, %v149_v26  ;;  %v274_v41 = vmax.f32 %v146_v22, %v210_v32  ;;  %v275_v42 = vmax.f32 %v147_v24, %v211_v33  ;;  %v276_v43 = vmax.f32 %v148_v25, %v212_v34  ;;  %v30_v23 = vld [vmem:[%s1101_s0 + $0x98] sm:$0xff]  ;;  %v31_v28 = vld [vmem:[%s1101_s0 + $0xa0] sm:$0xff]  ;;  %v32_v33 = vld [vmem:[%s1101_s0 + $0xa8] sm:$0xff] }
   0xb   :  { %v214_v44 = vmul.f32 0.2, %v150_v27  ;;  %v470_v47 = vpack.c.bf16 %v272_v37, %v271_v36  ;;  %v151_v49 = vadd.f32 %v689_v3, %v85_v31  ;;  %v152_v50 = vadd.f32 %v689_v3, %v86_v35 }
   0xc   :  { %v277_v48 = vmax.f32 %v149_v26, %v213_v39  ;;  %v475_v53 = vpack.c.bf16 %v274_v41, %v273_v38  ;;  %v480_v54 = vpack.c.bf16 %v276_v43, %v275_v42  ;;  %v87_v56 = vmul.f32 %v684_v2, %v21_v40  ;;  %v33_v38 = vld [vmem:[%s1101_s0 + $0xb0] sm:$0xff]  ;;  %v34_v43 = vld [vmem:[%s1101_s0 + $0xb8] sm:$0xff] }
   0xd   :  { %v278_v55 = vmax.f32 %v150_v27, %v214_v44  ;;  %471 = vst [vmem:[%s1103_s2] sm:$0xff] %v470_v47   ;;  %v215_v57 = vmul.f32 0.2, %v151_v49  ;;  %v216_v58 = vmul.f32 0.2, %v152_v50  ;;  %v88_v59 = vmul.f32 %v684_v2, %v22_v45 }
   0xe   :  { %v89_v60 = vmul.f32 %v684_v2, %v23_v46  ;;  %627 = vst [vmem:[%s1103_s2 + $0x8] sm:$0xff] %v475_v53   ;;  %v153_v63 = vadd.f32 %v689_v3, %v87_v56  ;;  %v90_v0 = vmul.f32 %v684_v2, %v24_v51  ;;  %v91_v1 = vmul.f32 %v684_v2, %v25_v52 }
   0xf   :  { %v485_v62 = vpack.c.bf16 %v278_v55, %v277_v48  ;;  %628 = vst [vmem:[%s1103_s2 + $0x10] sm:$0xff] %v480_v54   ;;  %v279_v5 = vmax.f32 %v151_v49, %v215_v57  ;;  %v280_v6 = vmax.f32 %v152_v50, %v216_v58  ;;  %v154_v7 = vadd.f32 %v689_v3, %v88_v59  ;;  %v35_v48 = vld [vmem:[%s1101_s0 + $0xc0] sm:$0xff]  ;;  %v36_v57 = vld [vmem:[%s1101_s0 + $0xc8] sm:$0xff] }
  0x10   :  { %v155_v8 = vadd.f32 %v689_v3, %v89_v60  ;;  %v217_v9 = vmul.f32 0.2, %v153_v63  ;;  %v156_v10 = vadd.f32 %v689_v3, %v90_v0  ;;  %v92_v11 = vmul.f32 %v684_v2, %v26_v61 }
  0x11   :  { %629 = vst [vmem:[%s1103_s2 + $0x18] sm:$0xff] %v485_v62   ;;  %v157_v12 = vadd.f32 %v689_v3, %v91_v1  ;;  %v490_v14 = vpack.c.bf16 %v280_v6, %v279_v5  ;;  %v218_v15 = vmul.f32 0.2, %v154_v7  ;;  %v93_v17 = vmul.f32 %v684_v2, %v27_v4  ;;  %v37_v62 = vld [vmem:[%s1101_s0 + $0xd0] sm:$0xff]  ;;  %v38_v5 = vld [vmem:[%s1101_s0 + $0xd8] sm:$0xff] }
  0x12   :  { %v219_v16 = vmul.f32 0.2, %v155_v8  ;;  %v281_v19 = vmax.f32 %v153_v63, %v217_v9  ;;  %v220_v20 = vmul.f32 0.2, %v156_v10  ;;  %v158_v21 = vadd.f32 %v689_v3, %v92_v11 }
  0x13   :  { %v221_v22 = vmul.f32 0.2, %v157_v12  ;;  %630 = vst [vmem:[%s1103_s2 + $0x20] sm:$0xff] %v490_v14   ;;  %v282_v24 = vmax.f32 %v154_v7, %v218_v15  ;;  %v94_v26 = vmul.f32 %v684_v2, %v28_v13  ;;  %v159_v27 = vadd.f32 %v689_v3, %v93_v17  ;;  %v40_v15 = vld [vmem:[%s1101_s0 + $0xe8] sm:$0xff] }
  0x14   :  { %v283_v25 = vmax.f32 %v155_v8, %v219_v16  ;;  %v284_v29 = vmax.f32 %v156_v10, %v220_v20  ;;  %v222_v30 = vmul.f32 0.2, %v158_v21  ;;  %v95_v32 = vmul.f32 %v684_v2, %v29_v18  ;;  %v39_v10 = vld [vmem:[%s1101_s0 + $0xe0] sm:$0xff]  ;;  %v41_v20 = vld [vmem:[%s1101_s0 + $0xf0] sm:$0xff] }
  0x15   :  { %v285_v31 = vmax.f32 %v157_v12, %v221_v22  ;;  %v495_v34 = vpack.c.bf16 %v282_v24, %v281_v19  ;;  %v160_v35 = vadd.f32 %v689_v3, %v94_v26  ;;  %v223_v36 = vmul.f32 0.2, %v159_v27 }
  0x16   :  { %v96_v37 = vmul.f32 %v684_v2, %v30_v23  ;;  %v500_v39 = vpack.c.bf16 %v284_v29, %v283_v25  ;;  %v286_v40 = vmax.f32 %v158_v21, %v222_v30  ;;  %v161_v41 = vadd.f32 %v689_v3, %v95_v32  ;;  %v42_v25 = vld [vmem:[%s1101_s0 + $0xf8] sm:$0xff]  ;;  %v43_v30 = vld [vmem:[%s1101_s0 + $0x100] sm:$0xff] }
  0x17   :  { %v97_v42 = vmul.f32 %v684_v2, %v31_v28  ;;  %631 = vst [vmem:[%s1103_s2 + $0x28] sm:$0xff] %v495_v34   ;;  %v224_v44 = vmul.f32 0.2, %v160_v35  ;;  %v287_v45 = vmax.f32 %v159_v27, %v223_v36  ;;  %v98_v47 = vmul.f32 %v684_v2, %v32_v33 }
  0x18   :  { %v162_v46 = vadd.f32 %v689_v3, %v96_v37  ;;  %632 = vst [vmem:[%s1103_s2 + $0x30] sm:$0xff] %v500_v39   ;;  %v505_v49 = vpack.c.bf16 %v286_v40, %v285_v31  ;;  %v225_v50 = vmul.f32 0.2, %v161_v41  ;;  %v99_v52 = vmul.f32 %v684_v2, %v33_v38  ;;  %v44_v39 = vld [vmem:[%s1101_s0 + $0x108] sm:$0xff] }
  0x19   :  { %v163_v51 = vadd.f32 %v689_v3, %v97_v42  ;;  %v288_v53 = vmax.f32 %v160_v35, %v224_v44  ;;  %v164_v55 = vadd.f32 %v689_v3, %v98_v47  ;;  %v100_v56 = vmul.f32 %v684_v2, %v34_v43  ;;  %v45_v44 = vld [vmem:[%s1101_s0 + $0x110] sm:$0xff] }
  0x1a   :  { %v226_v54 = vmul.f32 0.2, %v162_v46  ;;  %633 = vst [vmem:[%s1103_s2 + $0x38] sm:$0xff] %v505_v49   ;;  %v289_v58 = vmax.f32 %v161_v41, %v225_v50  ;;  %v165_v60 = vadd.f32 %v689_v3, %v99_v52  ;;  %v101_v61 = vmul.f32 %v684_v2, %v35_v48  ;;  %v46_v49 = vld [vmem:[%s1101_s0 + $0x118] sm:$0xff] }
  0x1b   :  { %v227_v59 = vmul.f32 0.2, %v163_v51  ;;  %v510_v63 = vpack.c.bf16 %v288_v53, %v287_v45  ;;  %v228_v1 = vmul.f32 0.2, %v164_v55  ;;  %v166_v4 = vadd.f32 %v689_v3, %v100_v56 }
  0x1c   :  { %v290_v0 = vmax.f32 %v162_v46, %v226_v54  ;;  %v229_v7 = vmul.f32 0.2, %v165_v60  ;;  %v102_v8 = vmul.f32 %v684_v2, %v36_v57  ;;  %v167_v9 = vadd.f32 %v689_v3, %v101_v61  ;;  %v47_v54 = vld [vmem:[%s1101_s0 + $0x120] sm:$0xff] }
  0x1d   :  { %v291_v6 = vmax.f32 %v163_v51, %v227_v59  ;;  %634 = vst [vmem:[%s1103_s2 + $0x40] sm:$0xff] %v510_v63   ;;  %v292_v12 = vmax.f32 %v164_v55, %v228_v1  ;;  %v230_v13 = vmul.f32 0.2, %v166_v4  ;;  %v103_v14 = vmul.f32 %v684_v2, %v37_v62  ;;  %v48_v59 = vld [vmem:[%s1101_s0 + $0x128] sm:$0xff] }
  0x1e   :  { %v515_v11 = vpack.c.bf16 %v290_v0, %v289_v58  ;;  %v293_v16 = vmax.f32 %v165_v60, %v229_v7  ;;  %v168_v17 = vadd.f32 %v689_v3, %v102_v8  ;;  %v231_v18 = vmul.f32 0.2, %v167_v9  ;;  %v49_v0 = vld [vmem:[%s1101_s0 + $0x130] sm:$0xff]  ;;  %v50_v7 = vld [vmem:[%s1101_s0 + $0x138] sm:$0xff] }
  0x1f   :  { %v104_v19 = vmul.f32 %v684_v2, %v38_v5  ;;  %v520_v21 = vpack.c.bf16 %v292_v12, %v291_v6  ;;  %v294_v22 = vmax.f32 %v166_v4, %v230_v13  ;;  %v169_v23 = vadd.f32 %v689_v3, %v103_v14  ;;  %v51_v12 = vld [vmem:[%s1101_s0 + $0x140] sm:$0xff] }
  0x20   :  { %635 = vst [vmem:[%s1103_s2 + $0x48] sm:$0xff] %v515_v11   ;;  %v105_v24 = vmul.f32 %v684_v2, %v39_v10  ;;  %v232_v26 = vmul.f32 0.2, %v168_v17  ;;  %v295_v27 = vmax.f32 %v167_v9, %v231_v18  ;;  %v106_v29 = vmul.f32 %v684_v2, %v40_v15 }
  0x21   :  { %v170_v28 = vadd.f32 %v689_v3, %v104_v19  ;;  %636 = vst [vmem:[%s1103_s2 + $0x50] sm:$0xff] %v520_v21   ;;  %v525_v31 = vpack.c.bf16 %v294_v22, %v293_v16  ;;  %v233_v32 = vmul.f32 0.2, %v169_v23  ;;  %v107_v34 = vmul.f32 %v684_v2, %v41_v20  ;;  %v52_v21 = vld [vmem:[%s1101_s0 + $0x148] sm:$0xff] }
  0x22   :  { %v171_v33 = vadd.f32 %v689_v3, %v105_v24  ;;  %v296_v35 = vmax.f32 %v168_v17, %v232_v26  ;;  %v172_v37 = vadd.f32 %v689_v3, %v106_v29  ;;  %v108_v38 = vmul.f32 %v684_v2, %v42_v25  ;;  %v53_v26 = vld [vmem:[%s1101_s0 + $0x150] sm:$0xff] }
  0x23   :  { %v234_v36 = vmul.f32 0.2, %v170_v28  ;;  %637 = vst [vmem:[%s1103_s2 + $0x58] sm:$0xff] %v525_v31   ;;  %v297_v40 = vmax.f32 %v169_v23, %v233_v32  ;;  %v173_v42 = vadd.f32 %v689_v3, %v107_v34  ;;  %v109_v43 = vmul.f32 %v684_v2, %v43_v30  ;;  %v54_v31 = vld [vmem:[%s1101_s0 + $0x158] sm:$0xff] }
  0x24   :  { %v235_v41 = vmul.f32 0.2, %v171_v33  ;;  %v530_v45 = vpack.c.bf16 %v296_v35, %v295_v27  ;;  %v236_v47 = vmul.f32 0.2, %v172_v37  ;;  %v174_v48 = vadd.f32 %v689_v3, %v108_v38 }
  0x25   :  { %v298_v46 = vmax.f32 %v170_v28, %v234_v36  ;;  %v237_v51 = vmul.f32 0.2, %v173_v42  ;;  %v110_v52 = vmul.f32 %v684_v2, %v44_v39  ;;  %v175_v53 = vadd.f32 %v689_v3, %v109_v43  ;;  %v55_v36 = vld [vmem:[%s1101_s0 + $0x160] sm:$0xff] }
  0x26   :  { %v299_v50 = vmax.f32 %v171_v33, %v235_v41  ;;  %638 = vst [vmem:[%s1103_s2 + $0x60] sm:$0xff] %v530_v45   ;;  %v300_v56 = vmax.f32 %v172_v37, %v236_v47  ;;  %v238_v57 = vmul.f32 0.2, %v174_v48  ;;  %v111_v58 = vmul.f32 %v684_v2, %v45_v44  ;;  %v56_v41 = vld [vmem:[%s1101_s0 + $0x168] sm:$0xff] }
  0x27   :  { %v535_v55 = vpack.c.bf16 %v298_v46, %v297_v40  ;;  %v301_v60 = vmax.f32 %v173_v42, %v237_v51  ;;  %v176_v61 = vadd.f32 %v689_v3, %v110_v52  ;;  %v239_v62 = vmul.f32 0.2, %v175_v53  ;;  %v57_v46 = vld [vmem:[%s1101_s0 + $0x170] sm:$0xff]  ;;  %v58_v51 = vld [vmem:[%s1101_s0 + $0x178] sm:$0xff] }
  0x28   :  { %v112_v63 = vmul.f32 %v684_v2, %v46_v49  ;;  %v540_v1 = vpack.c.bf16 %v300_v56, %v299_v50  ;;  %v302_v4 = vmax.f32 %v174_v48, %v238_v57  ;;  %v177_v5 = vadd.f32 %v689_v3, %v111_v58  ;;  %v59_v56 = vld [vmem:[%s1101_s0 + $0x180] sm:$0xff] }
  0x29   :  { %639 = vst [vmem:[%s1103_s2 + $0x68] sm:$0xff] %v535_v55   ;;  %v113_v6 = vmul.f32 %v684_v2, %v47_v54  ;;  %v240_v8 = vmul.f32 0.2, %v176_v61  ;;  %v303_v9 = vmax.f32 %v175_v53, %v239_v62  ;;  %v114_v11 = vmul.f32 %v684_v2, %v48_v59 }
  0x2a   :  { %v178_v10 = vadd.f32 %v689_v3, %v112_v63  ;;  %640 = vst [vmem:[%s1103_s2 + $0x70] sm:$0xff] %v540_v1   ;;  %v545_v13 = vpack.c.bf16 %v302_v4, %v301_v60  ;;  %v241_v14 = vmul.f32 0.2, %v177_v5  ;;  %v115_v16 = vmul.f32 %v684_v2, %v49_v0  ;;  %v60_v1 = vld [vmem:[%s1101_s0 + $0x188] sm:$0xff] }
  0x2b   :  { %v179_v15 = vadd.f32 %v689_v3, %v113_v6  ;;  %v304_v17 = vmax.f32 %v176_v61, %v240_v8  ;;  %v180_v19 = vadd.f32 %v689_v3, %v114_v11  ;;  %v116_v20 = vmul.f32 %v684_v2, %v50_v7  ;;  %v61_v8 = vld [vmem:[%s1101_s0 + $0x190] sm:$0xff] }
  0x2c   :  { %v242_v18 = vmul.f32 0.2, %v178_v10  ;;  %641 = vst [vmem:[%s1103_s2 + $0x78] sm:$0xff] %v545_v13   ;;  %v305_v22 = vmax.f32 %v177_v5, %v241_v14  ;;  %v181_v24 = vadd.f32 %v689_v3, %v115_v16  ;;  %v117_v25 = vmul.f32 %v684_v2, %v51_v12  ;;  %v62_v13 = vld [vmem:[%s1101_s0 + $0x198] sm:$0xff] }
  0x2d   :  { %v243_v23 = vmul.f32 0.2, %v179_v15  ;;  %v550_v27 = vpack.c.bf16 %v304_v17, %v303_v9  ;;  %v244_v29 = vmul.f32 0.2, %v180_v19  ;;  %v182_v30 = vadd.f32 %v689_v3, %v116_v20 }
  0x2e   :  { %v306_v28 = vmax.f32 %v178_v10, %v242_v18  ;;  %v245_v33 = vmul.f32 0.2, %v181_v24  ;;  %v118_v34 = vmul.f32 %v684_v2, %v52_v21  ;;  %v183_v35 = vadd.f32 %v689_v3, %v117_v25  ;;  %v63_v18 = vld [vmem:[%s1101_s0 + $0x1a0] sm:$0xff] }
  0x2f   :  { %v307_v32 = vmax.f32 %v179_v15, %v243_v23  ;;  %642 = vst [vmem:[%s1103_s2 + $0x80] sm:$0xff] %v550_v27   ;;  %v308_v38 = vmax.f32 %v180_v19, %v244_v29  ;;  %v246_v39 = vmul.f32 0.2, %v182_v30  ;;  %v119_v40 = vmul.f32 %v684_v2, %v53_v26  ;;  %v64_v23 = vld [vmem:[%s1101_s0 + $0x1a8] sm:$0xff] }
  0x30   :  { %v555_v37 = vpack.c.bf16 %v306_v28, %v305_v22  ;;  %v309_v42 = vmax.f32 %v181_v24, %v245_v33  ;;  %v184_v43 = vadd.f32 %v689_v3, %v118_v34  ;;  %v247_v44 = vmul.f32 0.2, %v183_v35  ;;  %v65_v28 = vld [vmem:[%s1101_s0 + $0x1b0] sm:$0xff]  ;;  %v66_v33 = vld [vmem:[%s1101_s0 + $0x1b8] sm:$0xff] }
  0x31   :  { %v120_v45 = vmul.f32 %v684_v2, %v54_v31  ;;  %v560_v47 = vpack.c.bf16 %v308_v38, %v307_v32  ;;  %v310_v48 = vmax.f32 %v182_v30, %v246_v39  ;;  %v185_v49 = vadd.f32 %v689_v3, %v119_v40  ;;  %v67_v38 = vld [vmem:[%s1101_s0 + $0x1c0] sm:$0xff] }
  0x32   :  { %643 = vst [vmem:[%s1103_s2 + $0x88] sm:$0xff] %v555_v37   ;;  %v121_v50 = vmul.f32 %v684_v2, %v55_v36  ;;  %v248_v52 = vmul.f32 0.2, %v184_v43  ;;  %v311_v53 = vmax.f32 %v183_v35, %v247_v44  ;;  %v122_v55 = vmul.f32 %v684_v2, %v56_v41 }
  0x33   :  { %v186_v54 = vadd.f32 %v689_v3, %v120_v45  ;;  %644 = vst [vmem:[%s1103_s2 + $0x90] sm:$0xff] %v560_v47   ;;  %v565_v57 = vpack.c.bf16 %v310_v48, %v309_v42  ;;  %v249_v58 = vmul.f32 0.2, %v185_v49  ;;  %v123_v60 = vmul.f32 %v684_v2, %v57_v46  ;;  %v68_v47 = vld [vmem:[%s1101_s0 + $0x1c8] sm:$0xff] }
  0x34   :  { %v187_v59 = vadd.f32 %v689_v3, %v121_v50  ;;  %v312_v61 = vmax.f32 %v184_v43, %v248_v52  ;;  %v188_v63 = vadd.f32 %v689_v3, %v122_v55  ;;  %v124_v0 = vmul.f32 %v684_v2, %v58_v51  ;;  %v69_v52 = vld [vmem:[%s1101_s0 + $0x1d0] sm:$0xff] }
  0x35   :  { %v250_v62 = vmul.f32 0.2, %v186_v54  ;;  %645 = vst [vmem:[%s1103_s2 + $0x98] sm:$0xff] %v565_v57   ;;  %v313_v4 = vmax.f32 %v185_v49, %v249_v58  ;;  %v189_v6 = vadd.f32 %v689_v3, %v123_v60  ;;  %v125_v7 = vmul.f32 %v684_v2, %v59_v56  ;;  %v70_v57 = vld [vmem:[%s1101_s0 + $0x1d8] sm:$0xff] }
  0x36   :  { %v251_v5 = vmul.f32 0.2, %v187_v59  ;;  %v570_v9 = vpack.c.bf16 %v312_v61, %v311_v53  ;;  %v252_v11 = vmul.f32 0.2, %v188_v63  ;;  %v190_v12 = vadd.f32 %v689_v3, %v124_v0 }
  0x37   :  { %v314_v10 = vmax.f32 %v186_v54, %v250_v62  ;;  %v253_v15 = vmul.f32 0.2, %v189_v6  ;;  %v126_v16 = vmul.f32 %v684_v2, %v60_v1  ;;  %v191_v17 = vadd.f32 %v689_v3, %v125_v7  ;;  %v71_v62 = vld [vmem:[%s1101_s0 + $0x1e0] sm:$0xff] }
  0x38   :  { %v315_v14 = vmax.f32 %v187_v59, %v251_v5  ;;  %646 = vst [vmem:[%s1103_s2 + $0xa0] sm:$0xff] %v570_v9   ;;  %v316_v20 = vmax.f32 %v188_v63, %v252_v11  ;;  %v254_v21 = vmul.f32 0.2, %v190_v12  ;;  %v127_v22 = vmul.f32 %v684_v2, %v61_v8  ;;  %v72_v5 = vld [vmem:[%s1101_s0 + $0x1e8] sm:$0xff] }
  0x39   :  { %v575_v19 = vpack.c.bf16 %v314_v10, %v313_v4  ;;  %v317_v24 = vmax.f32 %v189_v6, %v253_v15  ;;  %v192_v25 = vadd.f32 %v689_v3, %v126_v16  ;;  %v255_v26 = vmul.f32 0.2, %v191_v17  ;;  %v73_v10 = vld [vmem:[%s1101_s0 + $0x1f0] sm:$0xff]  ;;  %v74_v15 = vld [vmem:[%s1101_s0 + $0x1f8] sm:$0xff] }
  0x3a   :  { %v128_v27 = vmul.f32 %v684_v2, %v62_v13  ;;  %v580_v29 = vpack.c.bf16 %v316_v20, %v315_v14  ;;  %v318_v30 = vmax.f32 %v190_v12, %v254_v21  ;;  %v193_v31 = vadd.f32 %v689_v3, %v127_v22 }
  0x3b   :  { %647 = vst [vmem:[%s1103_s2 + $0xa8] sm:$0xff] %v575_v19   ;;  %v129_v32 = vmul.f32 %v684_v2, %v63_v18  ;;  %v256_v34 = vmul.f32 0.2, %v192_v25  ;;  %v319_v35 = vmax.f32 %v191_v17, %v255_v26  ;;  %v130_v37 = vmul.f32 %v684_v2, %v64_v23 }
  0x3c   :  { %v194_v36 = vadd.f32 %v689_v3, %v128_v27  ;;  %648 = vst [vmem:[%s1103_s2 + $0xb0] sm:$0xff] %v580_v29   ;;  %v585_v39 = vpack.c.bf16 %v318_v30, %v317_v24  ;;  %v257_v40 = vmul.f32 0.2, %v193_v31  ;;  %v131_v42 = vmul.f32 %v684_v2, %v65_v28 }
  0x3d   :  { %v195_v41 = vadd.f32 %v689_v3, %v129_v32  ;;  %v320_v43 = vmax.f32 %v192_v25, %v256_v34  ;;  %v196_v45 = vadd.f32 %v689_v3, %v130_v37  ;;  %v132_v46 = vmul.f32 %v684_v2, %v66_v33 }
  0x3e   :  { %v258_v44 = vmul.f32 0.2, %v194_v36  ;;  %649 = vst [vmem:[%s1103_s2 + $0xb8] sm:$0xff] %v585_v39   ;;  %v321_v48 = vmax.f32 %v193_v31, %v257_v40  ;;  %v197_v50 = vadd.f32 %v689_v3, %v131_v42  ;;  %v133_v51 = vmul.f32 %v684_v2, %v67_v38 }
  0x3f   :  { %v259_v49 = vmul.f32 0.2, %v195_v41  ;;  %v590_v53 = vpack.c.bf16 %v320_v43, %v319_v35  ;;  %v260_v55 = vmul.f32 0.2, %v196_v45  ;;  %v198_v56 = vadd.f32 %v689_v3, %v132_v46 }
  0x40   :  { %v322_v54 = vmax.f32 %v194_v36, %v258_v44  ;;  %v261_v59 = vmul.f32 0.2, %v197_v50  ;;  %v134_v60 = vmul.f32 %v684_v2, %v68_v47  ;;  %v199_v61 = vadd.f32 %v689_v3, %v133_v51 }
  0x41   :  { %v323_v58 = vmax.f32 %v195_v41, %v259_v49  ;;  %650 = vst [vmem:[%s1103_s2 + $0xc0] sm:$0xff] %v590_v53   ;;  %v324_v0 = vmax.f32 %v196_v45, %v260_v55  ;;  %v262_v1 = vmul.f32 0.2, %v198_v56  ;;  %v135_v4 = vmul.f32 %v684_v2, %v69_v52 }
  0x42   :  { %v595_v63 = vpack.c.bf16 %v322_v54, %v321_v48  ;;  %v325_v6 = vmax.f32 %v197_v50, %v261_v59  ;;  %v200_v7 = vadd.f32 %v689_v3, %v134_v60  ;;  %v263_v8 = vmul.f32 0.2, %v199_v61 }
  0x43   :  { %v136_v9 = vmul.f32 %v684_v2, %v70_v57  ;;  %v600_v11 = vpack.c.bf16 %v324_v0, %v323_v58  ;;  %v326_v12 = vmax.f32 %v198_v56, %v262_v1  ;;  %v201_v13 = vadd.f32 %v689_v3, %v135_v4 }
  0x44   :  { %651 = vst [vmem:[%s1103_s2 + $0xc8] sm:$0xff] %v595_v63   ;;  %v137_v14 = vmul.f32 %v684_v2, %v71_v62  ;;  %v264_v16 = vmul.f32 0.2, %v200_v7  ;;  %v327_v17 = vmax.f32 %v199_v61, %v263_v8  ;;  %v138_v19 = vmul.f32 %v684_v2, %v72_v5 }
  0x45   :  { %v202_v18 = vadd.f32 %v689_v3, %v136_v9  ;;  %652 = vst [vmem:[%s1103_s2 + $0xd0] sm:$0xff] %v600_v11   ;;  %v605_v20 = vpack.c.bf16 %v326_v12, %v325_v6  ;;  %v265_v21 = vmul.f32 0.2, %v201_v13  ;;  %v139_v23 = vmul.f32 %v684_v2, %v73_v10 }
  0x46   :  { %v203_v22 = vadd.f32 %v689_v3, %v137_v14  ;;  %v328_v24 = vmax.f32 %v200_v7, %v264_v16  ;;  %v204_v26 = vadd.f32 %v689_v3, %v138_v19  ;;  %v140_v27 = vmul.f32 %v684_v2, %v74_v15 }
  0x47   :  { %v266_v25 = vmul.f32 0.2, %v202_v18  ;;  %653 = vst [vmem:[%s1103_s2 + $0xd8] sm:$0xff] %v605_v20   ;;  %v329_v28 = vmax.f32 %v201_v13, %v265_v21  ;;  %v205_v30 = vadd.f32 %v689_v3, %v139_v23 }
  0x48   :  { %v267_v29 = vmul.f32 0.2, %v203_v22  ;;  %v610_v31 = vpack.c.bf16 %v328_v24, %v327_v17  ;;  %v268_v33 = vmul.f32 0.2, %v204_v26  ;;  %v206_v34 = vadd.f32 %v689_v3, %v140_v27 }
  0x49   :  { %v330_v32 = vmax.f32 %v202_v18, %v266_v25  ;;  %v269_v36 = vmul.f32 0.2, %v205_v30 }
  0x4a   :  { %v331_v35 = vmax.f32 %v203_v22, %v267_v29  ;;  %654 = vst [vmem:[%s1103_s2 + $0xe0] sm:$0xff] %v610_v31   ;;  %v332_v37 = vmax.f32 %v204_v26, %v268_v33  ;;  %v270_v38 = vmul.f32 0.2, %v206_v34 }
  0x4b   :  { %v615_v2 = vpack.c.bf16 %v330_v32, %v329_v28  ;;  %v333_v39 = vmax.f32 %v205_v30, %v269_v36 }
  0x4c   :  { %v620_v40 = vpack.c.bf16 %v332_v37, %v331_v35  ;;  %v334_v41 = vmax.f32 %v206_v34, %v270_v38 }
  0x4d   :  { %655 = vst [vmem:[%s1103_s2 + $0xe8] sm:$0xff] %v615_v2  }
  0x4e   :  { %656 = vst [vmem:[%s1103_s2 + $0xf0] sm:$0xff] %v620_v40   ;;  %v625_v3 = vpack.c.bf16 %v334_v41, %v333_v39 }
  0x50   :  { %657 = vst [vmem:[%s1103_s2 + $0xf8] sm:$0xff] %v625_v3  }

// kernel: _lambda_.6
= control target key start
LH: loop header
LB: loop body
LE: loop exit
PB: predicated region body
PF: predicated region fallthrough
CT: control target
= control target key end

     0   :  { %v380_v27 = vmov 0.0   ;;  %s512_s1 = inlined_call_operand.vmem [shape: bf16[128,128], index: 1, kind: input, shape index: {}]   ;;  %s513_s0 = inlined_call_operand.vmem [shape: bf16[128,128], index: 0, kind: input, shape index: {}]   ;;  %s514_s2 = inlined_call_operand.vmem [shape: f32[128,128], index: 2, kind: output, shape index: {0}]   ;;  %s515_s3 = inlined_call_operand.vmem [shape: f32[8,128], index: 3, kind: output, shape index: {1}]  }
   0x1   :  { %v354_v0 = vld [vmem:[%s512_s1 + $0x38] sm:$0xff]  ;;  %v353_v1 = vld [vmem:[%s512_s1 + $0x30] sm:$0xff]  ;;  %v352_v2 = vld [vmem:[%s512_s1 + $0x28] sm:$0xff]  ;;  %206 = vst [vmem:[%s515_s3] sm:$0xff] %v380_v27 }
   0x2   :  { %141 = vmatpush.bf16.msra.mxu0 %v354_v0  ;;  %355 = vmatpush.bf16.msra.mxu1 %v354_v0  ;;  %v351_v3 = vld [vmem:[%s512_s1 + $0x20] sm:$0xff]  ;;  %v350_v4 = vld [vmem:[%s512_s1 + $0x18] sm:$0xff]  ;;  %v349_v5 = vld [vmem:[%s512_s1 + $0x10] sm:$0xff] }
   0x3   :  { %356 = vmatpush.bf16.msra.mxu2 %v354_v0  ;;  %357 = vmatpush.bf16.msra.mxu3 %v354_v0  ;;  %v348_v6 = vld [vmem:[%s512_s1 + $0x8] sm:$0xff]  ;;  %v347_v7 = vld [vmem:[%s512_s1] sm:$0xff]  ;;  %v341_v9 = vld [vmem:[%s513_s0 + $0x10] sm:$0xff] }
   0x4   :  { %v339_v8 = vld [vmem:[%s513_s0] sm:$0xff]  ;;  %v345_v11 = vld [vmem:[%s513_s0 + $0x30] sm:$0xff]  ;;  %v340_v12 = vld [vmem:[%s513_s0 + $0x8] sm:$0xff] }
   0x5   :  { %v343_v10 = vld [vmem:[%s513_s0 + $0x20] sm:$0xff]  ;;  %v342_v13 = vld [vmem:[%s513_s0 + $0x18] sm:$0xff]  ;;  %v344_v14 = vld [vmem:[%s513_s0 + $0x28] sm:$0xff] }
   0x6   :  { %142 = vmatpush.bf16.msra.mxu0 %v353_v1  ;;  %358 = vmatpush.bf16.msra.mxu1 %v353_v1  ;;  %v346_v15 = vld [vmem:[%s513_s0 + $0x38] sm:$0xff] }
   0x7   :  { %359 = vmatpush.bf16.msra.mxu2 %v353_v1  ;;  %360 = vmatpush.bf16.msra.mxu3 %v353_v1 }
   0xa   :  { %143 = vmatpush.bf16.msra.mxu0 %v352_v2  ;;  %361 = vmatpush.bf16.msra.mxu1 %v352_v2 }
   0xb   :  { %362 = vmatpush.bf16.msra.mxu2 %v352_v2  ;;  %363 = vmatpush.bf16.msra.mxu3 %v352_v2 }
   0xe   :  { %144 = vmatpush.bf16.msra.mxu0 %v351_v3  ;;  %364 = vmatpush.bf16.msra.mxu1 %v351_v3 }
   0xf   :  { %365 = vmatpush.bf16.msra.mxu2 %v351_v3  ;;  %366 = vmatpush.bf16.msra.mxu3 %v351_v3 }
  0x12   :  { %145 = vmatpush.bf16.msra.mxu0 %v350_v4  ;;  %367 = vmatpush.bf16.msra.mxu1 %v350_v4 }
  0x13   :  { %368 = vmatpush.bf16.msra.mxu2 %v350_v4  ;;  %369 = vmatpush.bf16.msra.mxu3 %v350_v4 }
  0x16   :  { %146 = vmatpush.bf16.msra.mxu0 %v349_v5  ;;  %370 = vmatpush.bf16.msra.mxu1 %v349_v5 }
  0x17   :  { %371 = vmatpush.bf16.msra.mxu2 %v349_v5  ;;  %372 = vmatpush.bf16.msra.mxu3 %v349_v5 }
  0x1a   :  { %147 = vmatpush.bf16.msra.mxu0 %v348_v6  ;;  %373 = vmatpush.bf16.msra.mxu1 %v348_v6 }
  0x1b   :  { %374 = vmatpush.bf16.msra.mxu2 %v348_v6  ;;  %375 = vmatpush.bf16.msra.mxu3 %v348_v6 }
  0x1e   :  { %148 = vmatpush.bf16.msra.mxu0 %v347_v7  ;;  %376 = vmatpush.bf16.msra.mxu1 %v347_v7 }
  0x1f   :  { %377 = vmatpush.bf16.msra.mxu2 %v347_v7  ;;  %378 = vmatpush.bf16.msra.mxu3 %v347_v7 }
  0x21   :  { %149 = vmatmul.bf16.vlgmr.msra.gmra.mxu0 %v339_v8  ;;  %159 = vmatmul.bf16.vlgmr.msra.gmra.mxu1 %v341_v9 }
  0x22   :  { %169 = vmatmul.bf16.vlgmr.msra.gmra.mxu2 %v343_v10  ;;  %179 = vmatmul.bf16.vlgmr.msra.gmra.mxu3 %v345_v11 }
  0x31   :  { %154 = vmatmul.bf16.gmra.mxu0 %v340_v12  ;;  %164 = vmatmul.bf16.gmra.mxu1 %v342_v13 }
  0x32   :  { %174 = vmatmul.bf16.gmra.mxu2 %v344_v14  ;;  %184 = vmatmul.bf16.gmra.mxu3 %v346_v15 }
  0x9e   :  { %v150_v16 = vpop.f32.mrf.mxu0  ;;  %v160_v17 = vpop.f32.mrf.mxu1 }
  0x9f   :  { %190 = vst [vmem:[%s514_s2] sm:$0xff] %v150_v16  ;;  %v229_v28 = vmul.f32 %v150_v16, %v150_v16  ;;  %v233_v40 = vmul.f32 %v160_v17, %v160_v17 }
  0xa0   :  { %194 = vst [vmem:[%s514_s2 + $0x20] sm:$0xff] %v160_v17 }
  0xa5   :  { %v170_v18 = vpop.f32.mrf.mxu2  ;;  %v455_v19 = vpop.f32.mrf.mxu3 }
  0xa6   :  { %v152_v20 = vpop.f32.mrf.mxu0  ;;  %v162_v21 = vpop.f32.mrf.mxu1  ;;  %198 = vst [vmem:[%s514_s2 + $0x40] sm:$0xff] %v170_v18  ;;  %v237_v54 = vmul.f32 %v170_v18, %v170_v18  ;;  %v241_v2 = vmul.f32 %v455_v19, %v455_v19 }
  0xa7   :  { %191 = vst [vmem:[%s514_s2 + $0x8] sm:$0xff] %v152_v20  ;;  %v230_v26 = vmul.f32 %v152_v20, %v152_v20  ;;  %v207_v29 = vadd.f32 %v152_v20, %v150_v16  ;;  %v234_v43 = vmul.f32 %v162_v21, %v162_v21 }
  0xa8   :  { %195 = vst [vmem:[%s514_s2 + $0x28] sm:$0xff] %v162_v21 }
  0xa9   :  { %202 = vst [vmem:[%s514_s2 + $0x60] sm:$0xff] %v455_v19  ;;  %v245_v31 = vadd.f32 %v230_v26, %v229_v28 }
  0xad   :  { %v172_v22 = vpop.f32.mrf.mxu2  ;;  %v182_v23 = vpop.f32.mrf.mxu3 }
  0xae   :  { %v155_v24 = vpop.f32.mrf.mxu0  ;;  %v165_v25 = vpop.f32.mrf.mxu1  ;;  %199 = vst [vmem:[%s514_s2 + $0x48] sm:$0xff] %v172_v22  ;;  %v238_v57 = vmul.f32 %v172_v22, %v172_v22  ;;  %v242_v5 = vmul.f32 %v182_v23, %v182_v23 }
  0xaf   :  { %192 = vst [vmem:[%s514_s2 + $0x10] sm:$0xff] %v155_v24  ;;  %v231_v30 = vmul.f32 %v155_v24, %v155_v24  ;;  %v208_v32 = vadd.f32 %v207_v29, %v155_v24  ;;  %v235_v46 = vmul.f32 %v165_v25, %v165_v25 }
  0xb0   :  { %196 = vst [vmem:[%s514_s2 + $0x30] sm:$0xff] %v165_v25 }
  0xb1   :  { %203 = vst [vmem:[%s514_s2 + $0x68] sm:$0xff] %v182_v23  ;;  %v246_v37 = vadd.f32 %v245_v31, %v231_v30 }
  0xb5   :  { %v175_v33 = vpop.f32.mrf.mxu2  ;;  %v185_v34 = vpop.f32.mrf.mxu3 }
  0xb6   :  { %v157_v35 = vpop.f32.mrf.mxu0  ;;  %v167_v36 = vpop.f32.mrf.mxu1  ;;  %200 = vst [vmem:[%s514_s2 + $0x50] sm:$0xff] %v175_v33  ;;  %v239_v61 = vmul.f32 %v175_v33, %v175_v33  ;;  %v243_v9 = vmul.f32 %v185_v34, %v185_v34 }
  0xb7   :  { %193 = vst [vmem:[%s514_s2 + $0x18] sm:$0xff] %v157_v35  ;;  %v209_v38 = vadd.f32 %v208_v32, %v157_v35  ;;  %v232_v39 = vmul.f32 %v157_v35, %v157_v35  ;;  %v236_v52 = vmul.f32 %v167_v36, %v167_v36 }
  0xb8   :  { %197 = vst [vmem:[%s514_s2 + $0x38] sm:$0xff] %v167_v36 }
  0xb9   :  { %v210_v41 = vadd.f32 %v209_v38, %v160_v17  ;;  %v247_v42 = vadd.f32 %v246_v37, %v232_v39  ;;  %204 = vst [vmem:[%s514_s2 + $0x70] sm:$0xff] %v185_v34 }
  0xbb   :  { %v248_v44 = vadd.f32 %v247_v42, %v233_v40  ;;  %v211_v45 = vadd.f32 %v210_v41, %v162_v21 }
  0xbd   :  { %v212_v47 = vadd.f32 %v211_v45, %v165_v25  ;;  %v249_v48 = vadd.f32 %v248_v44, %v234_v43  ;;  %v177_v49 = vpop.f32.mrf.mxu2  ;;  %v187_v50 = vpop.f32.mrf.mxu3 }
  0xbe   :  { %201 = vst [vmem:[%s514_s2 + $0x58] sm:$0xff] %v177_v49  ;;  %v240_v1 = vmul.f32 %v177_v49, %v177_v49  ;;  %v244_v13 = vmul.f32 %v187_v50, %v187_v50 }
  0xbf   :  { %v213_v51 = vadd.f32 %v212_v47, %v167_v36  ;;  %v250_v53 = vadd.f32 %v249_v48, %v235_v46  ;;  %205 = vst [vmem:[%s514_s2 + $0x78] sm:$0xff] %v187_v50 }
  0xc1   :  { %v214_v55 = vadd.f32 %v213_v51, %v170_v18  ;;  %v251_v56 = vadd.f32 %v250_v53, %v236_v52 }
  0xc3   :  { %v252_v58 = vadd.f32 %v251_v56, %v237_v54  ;;  %v215_v59 = vadd.f32 %v214_v55, %v172_v22 }
  0xc5   :  { %v216_v60 = vadd.f32 %v215_v59, %v175_v33  ;;  %v253_v62 = vadd.f32 %v252_v58, %v238_v57 }
  0xc7   :  { %v254_v63 = vadd.f32 %v253_v62, %v239_v61  ;;  %v217_v0 = vadd.f32 %v216_v60, %v177_v49 }
  0xc9   :  { %v218_v3 = vadd.f32 %v217_v0, %v455_v19  ;;  %v255_v4 = vadd.f32 %v254_v63, %v240_v1 }
  0xcb   :  { %v256_v6 = vadd.f32 %v255_v4, %v241_v2  ;;  %v219_v7 = vadd.f32 %v218_v3, %v182_v23 }
  0xcd   :  { %v220_v8 = vadd.f32 %v219_v7, %v185_v34  ;;  %v257_v10 = vadd.f32 %v256_v6, %v242_v5 }
  0xcf   :  { %v258_v11 = vadd.f32 %v257_v10, %v243_v9  ;;  %v221_v12 = vadd.f32 %v220_v8, %v187_v50 }
  0xd1   :  { %v222_v14 = vrot.slane %v221_v12, 4  ;;  %v259_v15 = vadd.f32 %v258_v11, %v244_v13 }
  0xd3   :  { %v223_v16 = vadd.f32 %v222_v14, %v221_v12  ;;  %v260_v17 = vrot.slane %v259_v15, 4 }
  0xd5   :  { %v224_v18 = vrot.slane %v223_v16, 2  ;;  %v261_v20 = vadd.f32 %v260_v17, %v259_v15 }
  0xd7   :  { %v225_v21 = vadd.f32 %v224_v18, %v223_v16  ;;  %v262_v22 = vrot.slane %v261_v20, 2 }
  0xd9   :  { %v226_v24 = vrot.slane %v225_v21, 1  ;;  %v263_v19 = vadd.f32 %v262_v22, %v261_v20 }
  0xdb   :  { %v227_v25 = vadd.f32 %v226_v24, %v225_v21  ;;  %v264_v26 = vrot.slane %v263_v19, 1 }
  0xdd   :  { %228 = vst [vmem:[%s515_s3] sm:$0x1] %v227_v25  ;;  %v265_v23 = vadd.f32 %v264_v26, %v263_v19 }
  0xdf   :  { %266 = vst [vmem:[%s515_s3 + $0x1] sm:$0x1] %v265_v23 }

// kernel: _lambda_.7
= control target key start
LH: loop header
LB: loop body
LE: loop exit
PB: predicated region body
PF: predicated region fallthrough
CT: control target
= control target key end

     0   :  { %vm108_vm0 = vcmask 523264   ;;  %s613_s2 = inlined_call_operand.vmem [shape: bf16[64,128], index: 2, kind: input, shape index: {}]   ;;  %s614_s3 = inlined_call_operand.vmem [shape: f32[8,128], index: 3, kind: input, shape index: {}]   ;;  %s615_s1 = inlined_call_operand.vmem [shape: bf16[128,64], index: 1, kind: input, shape index: {}]   ;;  %s616_s0 = inlined_call_operand.vmem [shape: f32[128,128], index: 0, kind: input, shape index: {}, may-alias: {0,4}]   ;;  %s617_s4 = inlined_call_operand.vmem [shape: f32[128,128], index: 4, kind: output, shape index: {}, may-alias: {0,4}]  }
   0x1   :  { %v369_v0 = vld [vmem:[%s613_s2 + $0x18] sm:$0xff]  ;;  %v368_v1 = vld [vmem:[%s613_s2 + $0x10] sm:$0xff]  ;;  %v367_v2 = vld [vmem:[%s613_s2 + $0x8] sm:$0xff] }
   0x2   :  { %137 = vmatpush.bf16.msra.mxu0 %v369_v0  ;;  %370 = vmatpush.bf16.msra.mxu1 %v369_v0  ;;  %v366_v3 = vld [vmem:[%s613_s2] sm:$0xff]  ;;  %v360_v5 = vld [vmem:[%s615_s1 + $0x10] sm:$0xff]  ;;  %v359_v8 = vld [vmem:[%s615_s1 + $0x8] sm:$0xff] }
   0x3   :  { %371 = vmatpush.bf16.msra.mxu2 %v369_v0  ;;  %372 = vmatpush.bf16.msra.mxu3 %v369_v0  ;;  %v358_v4 = vld [vmem:[%s615_s1] sm:$0xff]  ;;  %v364_v7 = vld [vmem:[%s615_s1 + $0x30] sm:$0xff]  ;;  %v361_v9 = vld [vmem:[%s615_s1 + $0x18] sm:$0xff] }
   0x4   :  { %v362_v6 = vld [vmem:[%s615_s1 + $0x20] sm:$0xff]  ;;  %v363_v10 = vld [vmem:[%s615_s1 + $0x28] sm:$0xff]  ;;  %v365_v11 = vld [vmem:[%s615_s1 + $0x38] sm:$0xff] }
   0x5   :  { %v457_v12 = vld [vmem:[%s614_s3] ss:$0 sm:$0xff]  ;;  %v469_v16 = vld [vmem:[%s614_s3 + $0x1] ss:$0 sm:$0xff]  ;;  %v475_v18 = vld [vmem:[%s614_s3 + $0x2] ss:$0 sm:$0xff] }
   0x6   :  { %138 = vmatpush.bf16.msra.mxu0 %v368_v1  ;;  %373 = vmatpush.bf16.msra.mxu1 %v368_v1  ;;  %v182_v13 = vld [vmem:[%s616_s0] sm:$0xff]  ;;  %v183_v25 = vld [vmem:[%s616_s0 + $0x8] sm:$0xff]  ;;  %v184_v51 = vld [vmem:[%s616_s0 + $0x10] sm:$0xff] }
   0x7   :  { %374 = vmatpush.bf16.msra.mxu2 %v368_v1  ;;  %375 = vmatpush.bf16.msra.mxu3 %v368_v1  ;;  %v186_v14 = vld [vmem:[%s616_s0 + $0x20] sm:$0xff]  ;;  %v200_v15 = vmul.f32 %v457_v12, %v182_v13  ;;  %v187_v26 = vld [vmem:[%s616_s0 + $0x28] sm:$0xff]  ;;  %v201_v33 = vmul.f32 %v457_v12, %v183_v25  ;;  %v188_v52 = vld [vmem:[%s616_s0 + $0x30] sm:$0xff]  ;;  %v202_v61 = vmul.f32 %v457_v12, %v184_v51 }
   0x8   :  { %v204_v17 = vmul.f32 %v457_v12, %v186_v14  ;;  %v190_v21 = vld [vmem:[%s616_s0 + $0x40] sm:$0xff]  ;;  %v205_v34 = vmul.f32 %v457_v12, %v187_v26  ;;  %v191_v45 = vld [vmem:[%s616_s0 + $0x48] sm:$0xff]  ;;  %v206_v62 = vmul.f32 %v457_v12, %v188_v52 }
   0x9   :  { %v218_v19 = vadd.f32 %v469_v16, %v200_v15  ;;  %v194_v22 = vld [vmem:[%s616_s0 + $0x60] sm:$0xff]  ;;  %v208_v29 = vmul.f32 %v457_v12, %v190_v21  ;;  %v219_v43 = vadd.f32 %v469_v16, %v201_v33  ;;  %v195_v46 = vld [vmem:[%s616_s0 + $0x68] sm:$0xff]  ;;  %v209_v57 = vmul.f32 %v457_v12, %v191_v45 }
   0xa   :  { %139 = vmatpush.bf16.msra.mxu0 %v367_v2  ;;  %376 = vmatpush.bf16.msra.mxu1 %v367_v2  ;;  %v222_v20 = vadd.f32 %v469_v16, %v204_v17  ;;  %v212_v30 = vmul.f32 %v457_v12, %v194_v22  ;;  %v223_v44 = vadd.f32 %v469_v16, %v205_v34 }
   0xb   :  { %377 = vmatpush.bf16.msra.mxu2 %v367_v2  ;;  %378 = vmatpush.bf16.msra.mxu3 %v367_v2  ;;  %v226_v37 = vadd.f32 %v469_v16, %v208_v29  ;;  %v213_v58 = vmul.f32 %v457_v12, %v195_v46  ;;  %v224_v13 = vadd.f32 %v469_v16, %v206_v62 }
   0xc   :  { %v230_v38 = vadd.f32 %v469_v16, %v212_v30 }
   0xe   :  { %140 = vmatpush.bf16.msra.mxu0 %v366_v3  ;;  %379 = vmatpush.bf16.msra.mxu1 %v366_v3 }
   0xf   :  { %380 = vmatpush.bf16.msra.mxu2 %v366_v3  ;;  %381 = vmatpush.bf16.msra.mxu3 %v366_v3 }
  0x11   :  { %350 = vmatmul.msk.bf16.vlgmr.msra.gmra.mxu0 %vm108_vm0, %v358_v4  ;;  %352 = vmatmul.msk.bf16.vlgmr.msra.gmra.mxu1 %vm108_vm0, %v360_v5  ;;  %v227_v5 = vadd.f32 %v469_v16, %v209_v57 }
  0x12   :  { %354 = vmatmul.msk.bf16.vlgmr.msra.gmra.mxu2 %vm108_vm0, %v362_v6  ;;  %356 = vmatmul.msk.bf16.vlgmr.msra.gmra.mxu3 %vm108_vm0, %v364_v7  ;;  %v231_v6 = vadd.f32 %v469_v16, %v213_v58 }
  0x21   :  { %351 = vmatmul.msk.bf16.gmra.mxu0 %vm108_vm0, %v359_v8  ;;  %353 = vmatmul.msk.bf16.gmra.mxu1 %vm108_vm0, %v361_v9 }
  0x22   :  { %355 = vmatmul.msk.bf16.gmra.mxu2 %vm108_vm0, %v363_v10  ;;  %357 = vmatmul.msk.bf16.gmra.mxu3 %vm108_vm0, %v365_v11  ;;  %v220_v11 = vadd.f32 %v469_v16, %v202_v61 }
  0x8e   :  { %v142_v23 = vpop.f32.mrf.mxu0  ;;  %v152_v24 = vpop.f32.mrf.mxu1 }
  0x8f   :  { %v143_v27 = vadd.f32 %v475_v18, %v142_v23  ;;  %v153_v28 = vadd.f32 %v475_v18, %v152_v24 }
  0x91   :  { %v234_v31 = vadd.f32 %v218_v19, %v143_v27  ;;  %v238_v32 = vadd.f32 %v222_v20, %v153_v28 }
  0x93   :  { %v250_v35 = vmul.f32 0.2, %v234_v31  ;;  %v254_v36 = vmul.f32 0.2, %v238_v32 }
  0x95   :  { %v266_v39 = vmax.f32 %v234_v31, %v250_v35  ;;  %v270_v40 = vmax.f32 %v238_v32, %v254_v36  ;;  %v162_v41 = vpop.f32.mrf.mxu2  ;;  %v172_v42 = vpop.f32.mrf.mxu3 }
  0x96   :  { %v163_v47 = vadd.f32 %v475_v18, %v162_v41  ;;  %v173_v48 = vadd.f32 %v475_v18, %v172_v42  ;;  %v144_v49 = vpop.f32.mrf.mxu0  ;;  %v154_v50 = vpop.f32.mrf.mxu1 }
  0x97   :  { %282 = vst [vmem:[%s617_s4] sm:$0xff] %v266_v39  ;;  %v145_v53 = vadd.f32 %v475_v18, %v144_v49  ;;  %v155_v54 = vadd.f32 %v475_v18, %v154_v50 }
  0x98   :  { %286 = vst [vmem:[%s617_s4 + $0x20] sm:$0xff] %v270_v40  ;;  %v242_v55 = vadd.f32 %v226_v37, %v163_v47  ;;  %v246_v56 = vadd.f32 %v230_v38, %v173_v48 }
  0x99   :  { %v235_v59 = vadd.f32 %v219_v43, %v145_v53  ;;  %v239_v60 = vadd.f32 %v223_v44, %v155_v54 }
  0x9a   :  { %v258_v63 = vmul.f32 0.2, %v242_v55  ;;  %v262_v0 = vmul.f32 0.2, %v246_v56 }
  0x9b   :  { %v251_v1 = vmul.f32 0.2, %v235_v59  ;;  %v255_v2 = vmul.f32 0.2, %v239_v60 }
  0x9c   :  { %v274_v3 = vmax.f32 %v242_v55, %v258_v63  ;;  %v278_v4 = vmax.f32 %v246_v56, %v262_v0 }
  0x9d   :  { %v267_v7 = vmax.f32 %v235_v59, %v251_v1  ;;  %v271_v8 = vmax.f32 %v239_v60, %v255_v2  ;;  %v164_v9 = vpop.f32.mrf.mxu2  ;;  %v174_v10 = vpop.f32.mrf.mxu3 }
  0x9e   :  { %v165_v17 = vadd.f32 %v475_v18, %v164_v9  ;;  %v175_v19 = vadd.f32 %v475_v18, %v174_v10  ;;  %v147_v20 = vpop.f32.mrf.mxu0  ;;  %v157_v21 = vpop.f32.mrf.mxu1 }
  0x9f   :  { %v192_v14 = vld [vmem:[%s616_s0 + $0x50] sm:$0xff]  ;;  %v148_v24 = vadd.f32 %v475_v18, %v147_v20  ;;  %v158_v25 = vadd.f32 %v475_v18, %v157_v21 }
  0xa0   :  { %v196_v15 = vld [vmem:[%s616_s0 + $0x70] sm:$0xff]  ;;  %v243_v26 = vadd.f32 %v227_v5, %v165_v17  ;;  %v247_v27 = vadd.f32 %v231_v6, %v175_v19  ;;  %v210_v28 = vmul.f32 %v457_v12, %v192_v14 }
  0xa1   :  { %290 = vst [vmem:[%s617_s4 + $0x40] sm:$0xff] %v274_v3  ;;  %v214_v29 = vmul.f32 %v457_v12, %v196_v15  ;;  %v236_v30 = vadd.f32 %v220_v11, %v148_v24  ;;  %v240_v31 = vadd.f32 %v224_v13, %v158_v25 }
  0xa2   :  { %v259_v34 = vmul.f32 0.2, %v243_v26  ;;  %v263_v35 = vmul.f32 0.2, %v247_v27  ;;  %v228_v40 = vadd.f32 %v469_v16, %v210_v28 }
  0xa3   :  { %v252_v36 = vmul.f32 0.2, %v236_v30  ;;  %v256_v37 = vmul.f32 0.2, %v240_v31  ;;  %v232_v41 = vadd.f32 %v469_v16, %v214_v29 }
  0xa4   :  { %v275_v38 = vmax.f32 %v243_v26, %v259_v34  ;;  %v279_v39 = vmax.f32 %v247_v27, %v263_v35 }
  0xa5   :  { %v268_v42 = vmax.f32 %v236_v30, %v252_v36  ;;  %v272_v43 = vmax.f32 %v240_v31, %v256_v37  ;;  %v167_v44 = vpop.f32.mrf.mxu2  ;;  %v177_v45 = vpop.f32.mrf.mxu3 }
  0xa6   :  { %v168_v50 = vadd.f32 %v475_v18, %v167_v44  ;;  %v178_v51 = vadd.f32 %v475_v18, %v177_v45  ;;  %v149_v52 = vpop.f32.mrf.mxu0  ;;  %v159_v53 = vpop.f32.mrf.mxu1 }
  0xa7   :  { %v150_v54 = vadd.f32 %v475_v18, %v149_v52  ;;  %v160_v55 = vadd.f32 %v475_v18, %v159_v53 }
  0xa8   :  { %v185_v22 = vld [vmem:[%s616_s0 + $0x18] sm:$0xff]  ;;  %v244_v56 = vadd.f32 %v228_v40, %v168_v50  ;;  %v248_v57 = vadd.f32 %v232_v41, %v178_v51 }
  0xa9   :  { %v189_v23 = vld [vmem:[%s616_s0 + $0x38] sm:$0xff]  ;;  %v203_v32 = vmul.f32 %v457_v12, %v185_v22 }
  0xaa   :  { %294 = vst [vmem:[%s617_s4 + $0x60] sm:$0xff] %v278_v4  ;;  %v207_v33 = vmul.f32 %v457_v12, %v189_v23  ;;  %v260_v62 = vmul.f32 0.2, %v244_v56  ;;  %v264_v63 = vmul.f32 0.2, %v248_v57 }
  0xab   :  { %283 = vst [vmem:[%s617_s4 + $0x8] sm:$0xff] %v267_v7  ;;  %v221_v46 = vadd.f32 %v469_v16, %v203_v32 }
  0xac   :  { %287 = vst [vmem:[%s617_s4 + $0x28] sm:$0xff] %v271_v8  ;;  %v225_v47 = vadd.f32 %v469_v16, %v207_v33  ;;  %v276_v2 = vmax.f32 %v244_v56, %v260_v62  ;;  %v280_v3 = vmax.f32 %v248_v57, %v264_v63 }
  0xad   :  { %v237_v60 = vadd.f32 %v221_v46, %v150_v54  ;;  %v169_v8 = vpop.f32.mrf.mxu2 }
  0xae   :  { %v241_v61 = vadd.f32 %v225_v47, %v160_v55  ;;  %v170_v9 = vadd.f32 %v475_v18, %v169_v8 }
  0xaf   :  { %v253_v0 = vmul.f32 0.2, %v237_v60 }
  0xb0   :  { %v257_v1 = vmul.f32 0.2, %v241_v61 }
  0xb1   :  { %v269_v6 = vmax.f32 %v237_v60, %v253_v0 }
  0xb2   :  { %v273_v7 = vmax.f32 %v241_v61, %v257_v1 }
  0xb3   :  { %v193_v48 = vld [vmem:[%s616_s0 + $0x58] sm:$0xff] }
  0xb4   :  { %v197_v49 = vld [vmem:[%s616_s0 + $0x78] sm:$0xff]  ;;  %v211_v58 = vmul.f32 %v457_v12, %v193_v48 }
  0xb5   :  { %291 = vst [vmem:[%s617_s4 + $0x48] sm:$0xff] %v275_v38  ;;  %v215_v59 = vmul.f32 %v457_v12, %v197_v49  ;;  %v179_v12 = vpop.f32.mrf.mxu3 }
  0xb6   :  { %295 = vst [vmem:[%s617_s4 + $0x68] sm:$0xff] %v279_v39  ;;  %v229_v4 = vadd.f32 %v469_v16, %v211_v58  ;;  %v180_v10 = vadd.f32 %v475_v18, %v179_v12 }
  0xb7   :  { %284 = vst [vmem:[%s617_s4 + $0x10] sm:$0xff] %v268_v42  ;;  %v233_v5 = vadd.f32 %v469_v16, %v215_v59 }
  0xb8   :  { %288 = vst [vmem:[%s617_s4 + $0x30] sm:$0xff] %v272_v43  ;;  %v245_v16 = vadd.f32 %v229_v4, %v170_v9 }
  0xb9   :  { %292 = vst [vmem:[%s617_s4 + $0x50] sm:$0xff] %v276_v2  ;;  %v249_v11 = vadd.f32 %v233_v5, %v180_v10 }
  0xba   :  { %296 = vst [vmem:[%s617_s4 + $0x70] sm:$0xff] %v280_v3  ;;  %v261_v13 = vmul.f32 0.2, %v245_v16 }
  0xbb   :  { %285 = vst [vmem:[%s617_s4 + $0x18] sm:$0xff] %v269_v6  ;;  %v265_v14 = vmul.f32 0.2, %v249_v11 }
  0xbc   :  { %289 = vst [vmem:[%s617_s4 + $0x38] sm:$0xff] %v273_v7  ;;  %v277_v15 = vmax.f32 %v245_v16, %v261_v13 }
  0xbd   :  { %v281_v17 = vmax.f32 %v249_v11, %v265_v14 }
  0xbe   :  { %293 = vst [vmem:[%s617_s4 + $0x58] sm:$0xff] %v277_v15 }
  0xbf   :  { %297 = vst [vmem:[%s617_s4 + $0x78] sm:$0xff] %v281_v17 }

</bundles_post_ra>
